<compile_context>
chip_gen: v7x
topology: tpu7x:2x2x1
jax: 0.10.0
libtpu: 0.0.40
codegen_flags: <defaults>
</compile_context>

<pallas_src>
import math
import jax
import jax.numpy as jnp
from jax.experimental import pallas as pl
from jax.experimental.pallas import tpu as pltpu

# ---- synthetic model config (small stand-in for bert-base-uncased) ----------
VOCAB = 100
HIDDEN = 64
NUM_HEADS = 2
HEAD_DIM = HIDDEN // NUM_HEADS
FFN = 128
NUM_LAYERS = 2
MAX_SEQ = 16
LN_EPS = 1e-12


def _gelu(x):
    # tanh approximation of GELU (EUP-friendly inside the kernel)
    # TODO(synk): use erf-based GELU to match torch.nn.GELU bit-for-bit.
    return 0.5 * x * (1.0 + jnp.tanh(0.7978845608028654 * (x + 0.044715 * x * x * x)))


def _layernorm(x, g, b):
    mu = jnp.mean(x, axis=-1, keepdims=True)
    var = jnp.mean((x - mu) ** 2, axis=-1, keepdims=True)
    return (x - mu) * jax.lax.rsqrt(var + LN_EPS) * g + b


# ---------------------------- fused Pallas kernel -----------------------------
def bert_forward_kernel(x_ref, negb_ref, avgm_ref,
                        wqkv_ref, bqkv_ref, wo_ref, bo_ref,
                        ln1g_ref, ln1b_ref,
                        w1_ref, b1_ref, w2_ref, b2_ref,
                        ln2g_ref, ln2b_ref,
                        wout_ref, bout_ref,
                        o_ref, x_scr):
    """One (batch-element, layer) grid step; pooling + sigmoid head on last layer."""
    l = pl.program_id(1)
    S, H = x_scr.shape

    @pl.when(l == 0)
    def _():
        # new batch element: load its embedding-LN output into the carry scratch
        x_scr[...] = x_ref[0]

    x2 = x_scr[...]                          # [S, H] f32
    x2b = x2.astype(jnp.bfloat16)

    # ---- Q/K/V: three [S,H]x[H,H] MXU matmuls from one stacked weight block ----
    wqkv = wqkv_ref[...]                     # [3, H, H] bf16 (1/sqrt(hd) folded into Q)
    bqkv = bqkv_ref[...]                     # [3, 1, H] f32
    q2 = jnp.dot(x2b, wqkv[0], preferred_element_type=jnp.float32) + bqkv[0]
    k2 = jnp.dot(x2b, wqkv[1], preferred_element_type=jnp.float32) + bqkv[1]
    v2 = jnp.dot(x2b, wqkv[2], preferred_element_type=jnp.float32) + bqkv[2]

    # ---- all-heads attention: heads folded into the leading (batch) einsum dim ----
    # TODO(synk): batch tile is fixed to 1 here; for batch tiles > 1 fold (b, h)
    #   into the leading batch dim instead.
    def to_heads(t):                         # [S, H] -> [NH, S, HD]
        return jnp.stack(
            [t[:, h * HEAD_DIM:(h + 1) * HEAD_DIM] for h in range(NUM_HEADS)],
            axis=0).astype(jnp.bfloat16)

    qh, kh, vh = to_heads(q2), to_heads(k2), to_heads(v2)
    bias = jnp.broadcast_to(negb_ref[...], (NUM_HEADS, S, S))   # one broadcast / layer
    s = jnp.einsum('hqd,hkd->hqk', qh, kh,
                   preferred_element_type=jnp.float32) + bias
    s = s - jnp.max(s, axis=-1, keepdims=True)
    p = jnp.exp(s)
    p = p * pl.reciprocal(jnp.sum(p, axis=-1, keepdims=True), approx=True)
    ctx = jnp.einsum('hqk,hkd->hqd', p.astype(jnp.bfloat16), vh,
                     preferred_element_type=jnp.float32)        # [NH, S, HD]
    ctx2 = jnp.concatenate([ctx[h] for h in range(NUM_HEADS)], axis=-1)  # [S, H]

    # ---- output projection + post-LN ----
    attn = jnp.dot(ctx2.astype(jnp.bfloat16), wo_ref[...],
                   preferred_element_type=jnp.float32) + bo_ref[...]
    h1 = _layernorm(x2 + attn, ln1g_ref[...], ln1b_ref[...])

    # ---- FFN + post-LN ----
    ff = jnp.dot(h1.astype(jnp.bfloat16), w1_ref[...],
                 preferred_element_type=jnp.float32) + b1_ref[...]
    ff = _gelu(ff)
    ff = jnp.dot(ff.astype(jnp.bfloat16), w2_ref[...],
                 preferred_element_type=jnp.float32) + b2_ref[...]
    xn = _layernorm(h1 + ff, ln2g_ref[...], ln2b_ref[...])      # [S, H]

    x_scr[...] = xn                          # carry activation to next layer step

    # ---- last layer: masked mean pooling + output Linear + sigmoid ----
    @pl.when(l == pl.num_programs(1) - 1)
    def _():
        m = avgm_ref[0]                                              # [1, S] f32
        pooled = jnp.dot(m, xn, preferred_element_type=jnp.float32)  # [1, H]
        denom = jnp.sum(m, axis=-1, keepdims=True)                   # [1, 1]
        # NOTE: guard keeps all-zero avg_mask rows finite (reference would NaN).
        pooling = pooled / jnp.maximum(denom, 1.0)
        # hidden_layer_size == 0 -> no ReLU hidden layer; dropout identity at eval.
        logits = jnp.sum(pooling * wout_ref[...], axis=-1, keepdims=True) + bout_ref[...]
        o_ref[...] = jax.nn.sigmoid(logits).reshape(1, 1, 1)


# ------------------------------ wrapper ----------------------------------------
def bert_forward(params, input_word_ids, input_masks, input_segments,
                 avg_mask, positions):
    emb_params, stacked, head_params = params
    # positions unused (positions=False default); hidden_layer_size=0; eval dropout=id.
    del positions

    # plain-JAX glue: embedding gathers + embedding LayerNorm
    x = embed(emb_params, input_word_ids, input_segments)            # [B, S, H] f32
    B, S, H = x.shape
    neg_bias = ((1.0 - input_masks.astype(jnp.float32)) * -1e9).reshape(B, 1, S)
    avg_f = avg_mask.astype(jnp.float32).reshape(B, 1, S)
    w_out, b_out = head_params

    def layer_spec(arr):
        # one layer slice per grid step; leading (layer) dim squeezed out.
        if arr.ndim == 4:
            idx = lambda b, l: (l, 0, 0, 0)
        else:
            idx = lambda b, l: (l, 0, 0)
        return pl.BlockSpec((None,) + tuple(arr.shape[1:]), idx)

    in_specs = (
        [pl.BlockSpec((1, S, H), lambda b, l: (b, 0, 0)),    # embedding output
         pl.BlockSpec((1, 1, S), lambda b, l: (b, 0, 0)),    # attention mask bias
         pl.BlockSpec((1, 1, S), lambda b, l: (b, 0, 0))]    # avg mask
        + [layer_spec(a) for a in stacked]                   # per-layer weights
        + [pl.BlockSpec((1, H), lambda b, l: (0, 0)),        # head weight
           pl.BlockSpec((1, 1), lambda b, l: (0, 0))]        # head bias
    )
    out_spec = pl.BlockSpec((1, 1, 1), lambda b, l: (b, 0, 0))

    args = (x, neg_bias, avg_f) + tuple(stacked) + (w_out, b_out)
    out = pl.pallas_call(
        bert_forward_kernel,
        out_shape=jax.ShapeDtypeStruct((B, 1, 1), jnp.float32),
        grid_spec=pltpu.PrefetchScalarGridSpec(
            num_scalar_prefetch=0,
            grid=(B, NUM_LAYERS),                  # batch 'parallel', layer 'arbitrary'
            in_specs=in_specs,
            out_specs=out_spec,
            scratch_shapes=[pltpu.VMEM((S, H), jnp.float32)],   # activation carry
        ),
        compiler_params=pltpu.CompilerParams(
            dimension_semantics=("parallel", "arbitrary"),
            vmem_limit_bytes=32 * 1024 * 1024,
        ),
    )(*args)
    # TODO(synk): at real sizes, use batch tiles > 1 (or layer-major grid order)
    #   to amortize per-layer weight DMA across the whole batch.
    return out.reshape(B, 1)


# ------------------------- parameters & embeddings ----------------------------
def init_params(key):
    keys = iter(jax.random.split(key, 32))

    def nrm(shape):
        return 0.02 * jax.random.normal(next(keys), shape, jnp.float32)

    emb = (
        nrm((VOCAB, HIDDEN)),               # word embeddings
        nrm((MAX_SEQ, HIDDEN)),             # position embeddings
        nrm((2, HIDDEN)),                   # token-type embeddings
        jnp.ones((HIDDEN,), jnp.float32),   # emb LN gamma
        jnp.zeros((HIDDEN,), jnp.float32),  # emb LN beta
    )

    scale = 1.0 / math.sqrt(HEAD_DIM)
    wqkv_l, bqkv_l, wo_l, bo_l = [], [], [], []
    ln1g_l, ln1b_l, w1_l, b1_l = [], [], [], []
    w2_l, b2_l, ln2g_l, ln2b_l = [], [], [], []
    for _ in range(NUM_LAYERS):
        wq, wk, wv = nrm((HIDDEN, HIDDEN)), nrm((HIDDEN, HIDDEN)), nrm((HIDDEN, HIDDEN))
        zeros_h = jnp.zeros((HIDDEN,), jnp.float32)
        # fold 1/sqrt(head_dim) attention scale into the Q projection
        wqkv_l.append(jnp.stack([wq * scale, wk, wv], axis=0))                  # [3, H, H]
        bqkv_l.append(jnp.stack([zeros_h, zeros_h, zeros_h], axis=0)[:, None, :])  # [3,1,H]
        wo_l.append(nrm((HIDDEN, HIDDEN)))                                      # [H, H]
        bo_l.append(jnp.zeros((1, HIDDEN), jnp.float32))
        ln1g_l.append(jnp.ones((1, HIDDEN), jnp.float32))
        ln1b_l.append(jnp.zeros((1, HIDDEN), jnp.float32))
        w1_l.append(nrm((HIDDEN, FFN)))                                         # [H, F]
        b1_l.append(jnp.zeros((1, FFN), jnp.float32))
        w2_l.append(nrm((FFN, HIDDEN)))                                         # [F, H]
        b2_l.append(jnp.zeros((1, HIDDEN), jnp.float32))
        ln2g_l.append(jnp.ones((1, HIDDEN), jnp.float32))
        ln2b_l.append(jnp.zeros((1, HIDDEN), jnp.float32))

    stacked = (
        jnp.stack(wqkv_l).astype(jnp.bfloat16),   # wqkv [L, 3, H, H] bf16 (MXU operand)
        jnp.stack(bqkv_l),                        # bqkv [L, 3, 1, H] f32
        jnp.stack(wo_l).astype(jnp.bfloat16),     # wo   [L, H, H]  bf16
        jnp.stack(bo_l),                          # bo   [L, 1, H]
        jnp.stack(ln1g_l), jnp.stack(ln1b_l),     # ln1  [L, 1, H]
        jnp.stack(w1_l).astype(jnp.bfloat16),     # w1   [L, H, F]  bf16
        jnp.stack(b1_l),                          # b1   [L, 1, F]
        jnp.stack(w2_l).astype(jnp.bfloat16),     # w2   [L, F, H]  bf16
        jnp.stack(b2_l),                          # b2   [L, 1, H]
        jnp.stack(ln2g_l), jnp.stack(ln2b_l),     # ln2  [L, 1, H]
    )

    head = (
        nrm((1, HIDDEN)),                  # output_layer weight as a row [1, H]
        jnp.zeros((1, 1), jnp.float32),    # output_layer bias
    )
    return emb, stacked, head


def embed(emb_params, input_ids, token_type_ids):
    we, pe, te, g, b = emb_params
    S = input_ids.shape[1]
    pos_ids = jnp.arange(S)
    x = we[input_ids] + pe[pos_ids][None, :, :] + te[token_type_ids]
    return _layernorm(x, g, b)   # plain-JAX glue (gather + LN on embeddings)


# --------------------------------- main ----------------------------------------
if __name__ == "__main__":
    key = jax.random.PRNGKey(0)
    kp, ki1, ki2 = jax.random.split(key, 3)
    params = init_params(kp)

    B, S = 2, 8
    input_word_ids = jax.random.randint(ki1, (B, S), 0, VOCAB, dtype=jnp.int32)
    input_masks = jnp.ones((B, S), jnp.int32)
    input_segments = jnp.array([[0, 0, 0, 1, 1, 1, 1, 0],
                                [0, 0, 1, 1, 1, 1, 0, 0]], jnp.int32)
    avg_mask = input_segments            # as in the reference training loop
    positions = jax.random.normal(ki2, (B, 1), jnp.float32)  # unused by default cfg

    out = bert_forward(params, input_word_ids, input_masks, input_segments,
                       avg_mask, positions)
    out = jax.block_until_ready(out)
    assert out.shape == (B, 1) and out.dtype == jnp.float32
    assert bool(jnp.all(jnp.isfinite(out)))
    assert bool(jnp.all((out >= 0.0) & (out <= 1.0)))
    print("KERNEL_OK")
</pallas_src>

<mosaic_0001>
module attributes {stable_mosaic.version = 11 : i64} {
  func.func @bert_forward_kernel(%arg0: i32, %arg1: i32, %arg2: memref<1x8x64xf32, #tpu.memory_space<vmem>>, %arg3: memref<1x1x8xf32, #tpu.memory_space<vmem>>, %arg4: memref<1x1x8xf32, #tpu.memory_space<vmem>>, %arg5: memref<1x3x64x64xbf16, #tpu.memory_space<vmem>>, %arg6: memref<1x3x1x64xf32, #tpu.memory_space<vmem>>, %arg7: memref<1x64x64xbf16, #tpu.memory_space<vmem>>, %arg8: memref<1x1x64xf32, #tpu.memory_space<vmem>>, %arg9: memref<1x1x64xf32, #tpu.memory_space<vmem>>, %arg10: memref<1x1x64xf32, #tpu.memory_space<vmem>>, %arg11: memref<1x64x128xbf16, #tpu.memory_space<vmem>>, %arg12: memref<1x1x128xf32, #tpu.memory_space<vmem>>, %arg13: memref<1x128x64xbf16, #tpu.memory_space<vmem>>, %arg14: memref<1x1x64xf32, #tpu.memory_space<vmem>>, %arg15: memref<1x1x64xf32, #tpu.memory_space<vmem>>, %arg16: memref<1x1x64xf32, #tpu.memory_space<vmem>>, %arg17: memref<1x64xf32, #tpu.memory_space<vmem>>, %arg18: memref<1x1xf32, #tpu.memory_space<vmem>>, %arg19: memref<1x1x1xf32, #tpu.memory_space<vmem>>, %arg20: memref<8x64xf32, #tpu.memory_space<vmem>>) attributes {dimension_semantics = [#tpu.dimension_semantics<parallel>, #tpu.dimension_semantics<arbitrary>], iteration_bounds = array<i64: 2, 2>, scalar_prefetch = 0 : i64, scratch_operands = 1 : i64, tpu.core_type = #tpu.core_type<tc>, window_params = [{transform_indices = @transform_0, window_bounds = array<i64: 1, 8, 64>}, {transform_indices = @transform_1, window_bounds = array<i64: 1, 1, 8>}, {transform_indices = @transform_2, window_bounds = array<i64: 1, 1, 8>}, {transform_indices = @transform_3, window_bounds = array<i64: 1, 3, 64, 64>}, {transform_indices = @transform_4, window_bounds = array<i64: 1, 3, 1, 64>}, {transform_indices = @transform_5, window_bounds = array<i64: 1, 64, 64>}, {transform_indices = @transform_6, window_bounds = array<i64: 1, 1, 64>}, {transform_indices = @transform_7, window_bounds = array<i64: 1, 1, 64>}, {transform_indices = @transform_8, window_bounds = array<i64: 1, 1, 64>}, {transform_indices = @transform_9, window_bounds = array<i64: 1, 64, 128>}, {transform_indices = @transform_10, window_bounds = array<i64: 1, 1, 128>}, {transform_indices = @transform_11, window_bounds = array<i64: 1, 128, 64>}, {transform_indices = @transform_12, window_bounds = array<i64: 1, 1, 64>}, {transform_indices = @transform_13, window_bounds = array<i64: 1, 1, 64>}, {transform_indices = @transform_14, window_bounds = array<i64: 1, 1, 64>}, {pipeline_mode = #tpu.pipeline_mode<synchronous>, transform_indices = @transform_15, window_bounds = array<i64: 1, 64>}, {pipeline_mode = #tpu.pipeline_mode<synchronous>, transform_indices = @transform_16, window_bounds = array<i64: 1, 1>}, {transform_indices = @transform_17, window_bounds = array<i64: 1, 1, 1>}]} {
    %c0_i32 = arith.constant 0 : i32
    %0 = arith.cmpi eq, %arg1, %c0_i32 : i32
    %1 = arith.extui %0 : i1 to i32
    %c0_i32_0 = arith.constant 0 : i32
    %2 = arith.cmpi ne, %1, %c0_i32_0 : i32
    scf.if %2 {
      %c0_69 = arith.constant 0 : index
      %c0_70 = arith.constant 0 : index
      %c0_71 = arith.constant 0 : index
      %165 = vector.load %arg2[%c0_69, %c0_70, %c0_71] : memref<1x8x64xf32, #tpu.memory_space<vmem>>, vector<1x8x64xf32>
      %166 = vector.shape_cast %165 : vector<1x8x64xf32> to vector<8x64xf32>
      %c0_72 = arith.constant 0 : index
      %c0_73 = arith.constant 0 : index
      %167 = vector.load %arg20[%c0_72, %c0_73] : memref<8x64xf32, #tpu.memory_space<vmem>>, vector<8x64xf32>
      tpu.vector_store %arg20[%c0_72, %c0_73], %166 {strides = array<i32>} : memref<8x64xf32, #tpu.memory_space<vmem>>, vector<8x64xf32>,
    } else {
    }
    %c0 = arith.constant 0 : index
    %c0_1 = arith.constant 0 : index
    %3 = vector.load %arg20[%c0, %c0_1] : memref<8x64xf32, #tpu.memory_space<vmem>>, vector<8x64xf32>
    %4 = arith.truncf %3 : vector<8x64xf32> to vector<8x64xbf16>
    %c0_2 = arith.constant 0 : index
    %c0_3 = arith.constant 0 : index
    %c0_4 = arith.constant 0 : index
    %c0_5 = arith.constant 0 : index
    %5 = vector.load %arg5[%c0_2, %c0_3, %c0_4, %c0_5] : memref<1x3x64x64xbf16, #tpu.memory_space<vmem>>, vector<1x3x64x64xbf16>
    %6 = vector.shape_cast %5 : vector<1x3x64x64xbf16> to vector<3x64x64xbf16>
    %c0_6 = arith.constant 0 : index
    %c0_7 = arith.constant 0 : index
    %c0_8 = arith.constant 0 : index
    %c0_9 = arith.constant 0 : index
    %7 = vector.load %arg6[%c0_6, %c0_7, %c0_8, %c0_9] : memref<1x3x1x64xf32, #tpu.memory_space<vmem>>, vector<1x3x1x64xf32>
    %8 = vector.shape_cast %7 : vector<1x3x1x64xf32> to vector<3x1x64xf32>
    %9 = vector.extract_strided_slice %6 {offsets = [0, 0, 0], sizes = [1, 64, 64], strides = [1, 1, 1]} : vector<3x64x64xbf16> to vector<1x64x64xbf16>
    %10 = vector.shape_cast %9 : vector<1x64x64xbf16> to vector<64x64xbf16>
    %cst = arith.constant dense<0.000000e+00> : vector<8x64xf32>
    %11 = tpu.matmul %4, %10, %cst {dimension_numbers = #tpu.dot_dimension_numbers<[1], [0], [0], [1], [0, 0, 1, 1], [], []>} : vector<8x64xbf16>, vector<64x64xbf16>, vector<8x64xf32> -> vector<8x64xf32>
    %12 = vector.extract_strided_slice %8 {offsets = [0, 0, 0], sizes = [1, 1, 64], strides = [1, 1, 1]} : vector<3x1x64xf32> to vector<1x1x64xf32>
    %13 = vector.shape_cast %12 : vector<1x1x64xf32> to vector<1x64xf32>
    %14 = vector.broadcast %13 : vector<1x64xf32> to vector<8x64xf32>
    %15 = arith.addf %11, %14 : vector<8x64xf32>
    %16 = vector.extract_strided_slice %6 {offsets = [1, 0, 0], sizes = [1, 64, 64], strides = [1, 1, 1]} : vector<3x64x64xbf16> to vector<1x64x64xbf16>
    %17 = vector.shape_cast %16 : vector<1x64x64xbf16> to vector<64x64xbf16>
    %cst_10 = arith.constant dense<0.000000e+00> : vector<8x64xf32>
    %18 = tpu.matmul %4, %17, %cst_10 {dimension_numbers = #tpu.dot_dimension_numbers<[1], [0], [0], [1], [0, 0, 1, 1], [], []>} : vector<8x64xbf16>, vector<64x64xbf16>, vector<8x64xf32> -> vector<8x64xf32>
    %19 = vector.extract_strided_slice %8 {offsets = [1, 0, 0], sizes = [1, 1, 64], strides = [1, 1, 1]} : vector<3x1x64xf32> to vector<1x1x64xf32>
    %20 = vector.shape_cast %19 : vector<1x1x64xf32> to vector<1x64xf32>
    %21 = vector.broadcast %20 : vector<1x64xf32> to vector<8x64xf32>
    %22 = arith.addf %18, %21 : vector<8x64xf32>
    %23 = vector.extract_strided_slice %6 {offsets = [2, 0, 0], sizes = [1, 64, 64], strides = [1, 1, 1]} : vector<3x64x64xbf16> to vector<1x64x64xbf16>
    %24 = vector.shape_cast %23 : vector<1x64x64xbf16> to vector<64x64xbf16>
    %cst_11 = arith.constant dense<0.000000e+00> : vector<8x64xf32>
    %25 = tpu.matmul %4, %24, %cst_11 {dimension_numbers = #tpu.dot_dimension_numbers<[1], [0], [0], [1], [0, 0, 1, 1], [], []>} : vector<8x64xbf16>, vector<64x64xbf16>, vector<8x64xf32> -> vector<8x64xf32>
    %26 = vector.extract_strided_slice %8 {offsets = [2, 0, 0], sizes = [1, 1, 64], strides = [1, 1, 1]} : vector<3x1x64xf32> to vector<1x1x64xf32>
    %27 = vector.shape_cast %26 : vector<1x1x64xf32> to vector<1x64xf32>
    %28 = vector.broadcast %27 : vector<1x64xf32> to vector<8x64xf32>
    %29 = arith.addf %25, %28 : vector<8x64xf32>
    %30 = vector.extract_strided_slice %15 {offsets = [0, 0], sizes = [8, 32], strides = [1, 1]} : vector<8x64xf32> to vector<8x32xf32>
    %31 = vector.extract_strided_slice %15 {offsets = [0, 32], sizes = [8, 32], strides = [1, 1]} : vector<8x64xf32> to vector<8x32xf32>
    %32 = vector.shape_cast %30 : vector<8x32xf32> to vector<1x8x32xf32>
    %33 = vector.shape_cast %31 : vector<8x32xf32> to vector<1x8x32xf32>
    %34 = tpu.concatenate %32, %33 in 0 : vector<1x8x32xf32>, vector<1x8x32xf32> -> vector<2x8x32xf32>
    %35 = arith.truncf %34 : vector<2x8x32xf32> to vector<2x8x32xbf16>
    %36 = vector.extract_strided_slice %22 {offsets = [0, 0], sizes = [8, 32], strides = [1, 1]} : vector<8x64xf32> to vector<8x32xf32>
    %37 = vector.extract_strided_slice %22 {offsets = [0, 32], sizes = [8, 32], strides = [1, 1]} : vector<8x64xf32> to vector<8x32xf32>
    %38 = vector.shape_cast %36 : vector<8x32xf32> to vector<1x8x32xf32>
    %39 = vector.shape_cast %37 : vector<8x32xf32> to vector<1x8x32xf32>
    %40 = tpu.concatenate %38, %39 in 0 : vector<1x8x32xf32>, vector<1x8x32xf32> -> vector<2x8x32xf32>
    %41 = arith.truncf %40 : vector<2x8x32xf32> to vector<2x8x32xbf16>
    %42 = vector.extract_strided_slice %29 {offsets = [0, 0], sizes = [8, 32], strides = [1, 1]} : vector<8x64xf32> to vector<8x32xf32>
    %43 = vector.extract_strided_slice %29 {offsets = [0, 32], sizes = [8, 32], strides = [1, 1]} : vector<8x64xf32> to vector<8x32xf32>
    %44 = vector.shape_cast %42 : vector<8x32xf32> to vector<1x8x32xf32>
    %45 = vector.shape_cast %43 : vector<8x32xf32> to vector<1x8x32xf32>
    %46 = tpu.concatenate %44, %45 in 0 : vector<1x8x32xf32>, vector<1x8x32xf32> -> vector<2x8x32xf32>
    %47 = arith.truncf %46 : vector<2x8x32xf32> to vector<2x8x32xbf16>
    %c0_12 = arith.constant 0 : index
    %c0_13 = arith.constant 0 : index
    %c0_14 = arith.constant 0 : index
    %48 = vector.load %arg3[%c0_12, %c0_13, %c0_14] : memref<1x1x8xf32, #tpu.memory_space<vmem>>, vector<1x1x8xf32>
    %49 = vector.shape_cast %48 : vector<1x1x8xf32> to vector<1x1x8xf32>
    %50 = vector.broadcast %49 : vector<1x1x8xf32> to vector<2x8x8xf32>
    "tpu.trace_start"() <{level = 10 : i32, message = "hqd,hkd->hqk"}> : () -> ()
    %cst_15 = arith.constant dense<0.000000e+00> : vector<2x8x8xf32>
    %51 = tpu.matmul %35, %41, %cst_15 {dimension_numbers = #tpu.dot_dimension_numbers<[2], [2], [1], [1], [0, 0, 0, 1, 1, 1], [0], [0]>} : vector<2x8x32xbf16>, vector<2x8x32xbf16>, vector<2x8x8xf32> -> vector<2x8x8xf32>
    "tpu.trace_stop"() : () -> ()
    %52 = arith.addf %51, %50 : vector<2x8x8xf32>
    %cst_16 = arith.constant dense<0xFF800000> : vector<2x8xf32>
    %53 = vector.multi_reduction <maximumf>, %52, %cst_16 [2] : vector<2x8x8xf32> to vector<2x8xf32>
    %54 = vector.shape_cast %53 : vector<2x8xf32> to vector<2x8x1xf32>
    %55 = vector.broadcast %54 : vector<2x8x1xf32> to vector<2x8x8xf32>
    %56 = arith.subf %52, %55 : vector<2x8x8xf32>
    %57 = math.exp %56 : vector<2x8x8xf32>
    %cst_17 = arith.constant dense<0.000000e+00> : vector<2x8xf32>
    %58 = vector.multi_reduction <add>, %57, %cst_17 [2] : vector<2x8x8xf32> to vector<2x8xf32>
    %59 = vector.shape_cast %58 : vector<2x8xf32> to vector<2x8x1xf32>
    %60 = tpu.reciprocal %59 {approx = true} : vector<2x8x1xf32> -> vector<2x8x1xf32>
    %61 = vector.broadcast %60 : vector<2x8x1xf32> to vector<2x8x8xf32>
    %62 = arith.mulf %57, %61 : vector<2x8x8xf32>
    %63 = arith.truncf %62 : vector<2x8x8xf32> to vector<2x8x8xbf16>
    "tpu.trace_start"() <{level = 10 : i32, message = "hqk,hkd->hqd"}> : () -> ()
    %cst_18 = arith.constant dense<0.000000e+00> : vector<2x8x32xf32>
    %64 = tpu.matmul %63, %47, %cst_18 {dimension_numbers = #tpu.dot_dimension_numbers<[2], [1], [1], [2], [0, 0, 0, 1, 1, 2], [0], [0]>} : vector<2x8x8xbf16>, vector<2x8x32xbf16>, vector<2x8x32xf32> -> vector<2x8x32xf32>
    "tpu.trace_stop"() : () -> ()
    %65 = vector.extract_strided_slice %64 {offsets = [0, 0, 0], sizes = [1, 8, 32], strides = [1, 1, 1]} : vector<2x8x32xf32> to vector<1x8x32xf32>
    %66 = vector.shape_cast %65 : vector<1x8x32xf32> to vector<8x32xf32>
    %67 = vector.extract_strided_slice %64 {offsets = [1, 0, 0], sizes = [1, 8, 32], strides = [1, 1, 1]} : vector<2x8x32xf32> to vector<1x8x32xf32>
    %68 = vector.shape_cast %67 : vector<1x8x32xf32> to vector<8x32xf32>
    %69 = tpu.concatenate %66, %68 in 1 : vector<8x32xf32>, vector<8x32xf32> -> vector<8x64xf32>
    %70 = arith.truncf %69 : vector<8x64xf32> to vector<8x64xbf16>
    %c0_19 = arith.constant 0 : index
    %c0_20 = arith.constant 0 : index
    %c0_21 = arith.constant 0 : index
    %71 = vector.load %arg7[%c0_19, %c0_20, %c0_21] : memref<1x64x64xbf16, #tpu.memory_space<vmem>>, vector<1x64x64xbf16>
    %72 = vector.shape_cast %71 : vector<1x64x64xbf16> to vector<64x64xbf16>
    %cst_22 = arith.constant dense<0.000000e+00> : vector<8x64xf32>
    %73 = tpu.matmul %70, %72, %cst_22 {dimension_numbers = #tpu.dot_dimension_numbers<[1], [0], [0], [1], [0, 0, 1, 1], [], []>} : vector<8x64xbf16>, vector<64x64xbf16>, vector<8x64xf32> -> vector<8x64xf32>
    %c0_23 = arith.constant 0 : index
    %c0_24 = arith.constant 0 : index
    %c0_25 = arith.constant 0 : index
    %74 = vector.load %arg8[%c0_23, %c0_24, %c0_25] : memref<1x1x64xf32, #tpu.memory_space<vmem>>, vector<1x1x64xf32>
    %75 = vector.shape_cast %74 : vector<1x1x64xf32> to vector<1x64xf32>
    %76 = vector.broadcast %75 : vector<1x64xf32> to vector<8x64xf32>
    %77 = arith.addf %73, %76 : vector<8x64xf32>
    %78 = arith.addf %3, %77 : vector<8x64xf32>
    %c0_26 = arith.constant 0 : index
    %c0_27 = arith.constant 0 : index
    %c0_28 = arith.constant 0 : index
    %79 = vector.load %arg9[%c0_26, %c0_27, %c0_28] : memref<1x1x64xf32, #tpu.memory_space<vmem>>, vector<1x1x64xf32>
    %80 = vector.shape_cast %79 : vector<1x1x64xf32> to vector<1x64xf32>
    %c0_29 = arith.constant 0 : index
    %c0_30 = arith.constant 0 : index
    %c0_31 = arith.constant 0 : index
    %81 = vector.load %arg10[%c0_29, %c0_30, %c0_31] : memref<1x1x64xf32, #tpu.memory_space<vmem>>, vector<1x1x64xf32>
    %82 = vector.shape_cast %81 : vector<1x1x64xf32> to vector<1x64xf32>
    %cst_32 = arith.constant dense<0.000000e+00> : vector<8xf32>
    %83 = vector.multi_reduction <add>, %78, %cst_32 [1] : vector<8x64xf32> to vector<8xf32>
    %84 = vector.shape_cast %83 : vector<8xf32> to vector<8x1xf32>
    %cst_33 = arith.constant 6.400000e+01 : f32
    %85 = vector.broadcast %cst_33 : f32 to vector<8x1xf32>
    %86 = arith.divf %84, %85 : vector<8x1xf32>
    %87 = vector.broadcast %86 : vector<8x1xf32> to vector<8x64xf32>
    %88 = arith.subf %78, %87 : vector<8x64xf32>
    %89 = arith.mulf %88, %88 : vector<8x64xf32>
    %cst_34 = arith.constant dense<0.000000e+00> : vector<8xf32>
    %90 = vector.multi_reduction <add>, %89, %cst_34 [1] : vector<8x64xf32> to vector<8xf32>
    %91 = vector.shape_cast %90 : vector<8xf32> to vector<8x1xf32>
    %cst_35 = arith.constant 6.400000e+01 : f32
    %92 = vector.broadcast %cst_35 : f32 to vector<8x1xf32>
    %93 = arith.divf %91, %92 : vector<8x1xf32>
    %94 = vector.broadcast %86 : vector<8x1xf32> to vector<8x64xf32>
    %95 = arith.subf %78, %94 : vector<8x64xf32>
    %cst_36 = arith.constant 9.99999996E-13 : f32
    %96 = vector.broadcast %cst_36 : f32 to vector<8x1xf32>
    %97 = arith.addf %93, %96 : vector<8x1xf32>
    %98 = math.rsqrt %97 : vector<8x1xf32>
    %99 = vector.broadcast %98 : vector<8x1xf32> to vector<8x64xf32>
    %100 = arith.mulf %95, %99 : vector<8x64xf32>
    %101 = vector.broadcast %80 : vector<1x64xf32> to vector<8x64xf32>
    %102 = arith.mulf %100, %101 : vector<8x64xf32>
    %103 = vector.broadcast %82 : vector<1x64xf32> to vector<8x64xf32>
    %104 = arith.addf %102, %103 : vector<8x64xf32>
    %105 = arith.truncf %104 : vector<8x64xf32> to vector<8x64xbf16>
    %c0_37 = arith.constant 0 : index
    %c0_38 = arith.constant 0 : index
    %c0_39 = arith.constant 0 : index
    %106 = vector.load %arg11[%c0_37, %c0_38, %c0_39] : memref<1x64x128xbf16, #tpu.memory_space<vmem>>, vector<1x64x128xbf16>
    %107 = vector.shape_cast %106 : vector<1x64x128xbf16> to vector<64x128xbf16>
    %cst_40 = arith.constant dense<0.000000e+00> : vector<8x128xf32>
    %108 = tpu.matmul %105, %107, %cst_40 {dimension_numbers = #tpu.dot_dimension_numbers<[1], [0], [0], [1], [0, 0, 1, 1], [], []>} : vector<8x64xbf16>, vector<64x128xbf16>, vector<8x128xf32> -> vector<8x128xf32>
    %c0_41 = arith.constant 0 : index
    %c0_42 = arith.constant 0 : index
    %c0_43 = arith.constant 0 : index
    %109 = vector.load %arg12[%c0_41, %c0_42, %c0_43] : memref<1x1x128xf32, #tpu.memory_space<vmem>>, vector<1x1x128xf32>
    %110 = vector.shape_cast %109 : vector<1x1x128xf32> to vector<1x128xf32>
    %111 = vector.broadcast %110 : vector<1x128xf32> to vector<8x128xf32>
    %112 = arith.addf %108, %111 : vector<8x128xf32>
    %cst_44 = arith.constant 5.000000e-01 : f32
    %113 = vector.broadcast %cst_44 : f32 to vector<8x128xf32>
    %114 = arith.mulf %113, %112 : vector<8x128xf32>
    %cst_45 = arith.constant 4.471500e-02 : f32
    %115 = vector.broadcast %cst_45 : f32 to vector<8x128xf32>
    %116 = arith.mulf %115, %112 : vector<8x128xf32>
    %117 = arith.mulf %116, %112 : vector<8x128xf32>
    %118 = arith.mulf %117, %112 : vector<8x128xf32>
    %119 = arith.addf %112, %118 : vector<8x128xf32>
    %cst_46 = arith.constant 0.797884583 : f32
    %120 = vector.broadcast %cst_46 : f32 to vector<8x128xf32>
    %121 = arith.mulf %120, %119 : vector<8x128xf32>
    %122 = math.tanh %121 : vector<8x128xf32>
    %cst_47 = arith.constant 1.000000e+00 : f32
    %123 = vector.broadcast %cst_47 : f32 to vector<8x128xf32>
    %124 = arith.addf %123, %122 : vector<8x128xf32>
    %125 = arith.mulf %114, %124 : vector<8x128xf32>
    %126 = arith.truncf %125 : vector<8x128xf32> to vector<8x128xbf16>
    %c0_48 = arith.constant 0 : index
    %c0_49 = arith.constant 0 : index
    %c0_50 = arith.constant 0 : index
    %127 = vector.load %arg13[%c0_48, %c0_49, %c0_50] : memref<1x128x64xbf16, #tpu.memory_space<vmem>>, vector<1x128x64xbf16>
    %128 = vector.shape_cast %127 : vector<1x128x64xbf16> to vector<128x64xbf16>
    %cst_51 = arith.constant dense<0.000000e+00> : vector<8x64xf32>
    %129 = tpu.matmul %126, %128, %cst_51 {dimension_numbers = #tpu.dot_dimension_numbers<[1], [0], [0], [1], [0, 0, 1, 1], [], []>} : vector<8x128xbf16>, vector<128x64xbf16>, vector<8x64xf32> -> vector<8x64xf32>
    %c0_52 = arith.constant 0 : index
    %c0_53 = arith.constant 0 : index
    %c0_54 = arith.constant 0 : index
    %130 = vector.load %arg14[%c0_52, %c0_53, %c0_54] : memref<1x1x64xf32, #tpu.memory_space<vmem>>, vector<1x1x64xf32>
    %131 = vector.shape_cast %130 : vector<1x1x64xf32> to vector<1x64xf32>
    %132 = vector.broadcast %131 : vector<1x64xf32> to vector<8x64xf32>
    %133 = arith.addf %129, %132 : vector<8x64xf32>
    %134 = arith.addf %104, %133 : vector<8x64xf32>
    %c0_55 = arith.constant 0 : index
    %c0_56 = arith.constant 0 : index
    %c0_57 = arith.constant 0 : index
    %135 = vector.load %arg15[%c0_55, %c0_56, %c0_57] : memref<1x1x64xf32, #tpu.memory_space<vmem>>, vector<1x1x64xf32>
    %136 = vector.shape_cast %135 : vector<1x1x64xf32> to vector<1x64xf32>
    %c0_58 = arith.constant 0 : index
    %c0_59 = arith.constant 0 : index
    %c0_60 = arith.constant 0 : index
    %137 = vector.load %arg16[%c0_58, %c0_59, %c0_60] : memref<1x1x64xf32, #tpu.memory_space<vmem>>, vector<1x1x64xf32>
    %138 = vector.shape_cast %137 : vector<1x1x64xf32> to vector<1x64xf32>
    %cst_61 = arith.constant dense<0.000000e+00> : vector<8xf32>
    %139 = vector.multi_reduction <add>, %134, %cst_61 [1] : vector<8x64xf32> to vector<8xf32>
    %140 = vector.shape_cast %139 : vector<8xf32> to vector<8x1xf32>
    %cst_62 = arith.constant 6.400000e+01 : f32
    %141 = vector.broadcast %cst_62 : f32 to vector<8x1xf32>
    %142 = arith.divf %140, %141 : vector<8x1xf32>
    %143 = vector.broadcast %142 : vector<8x1xf32> to vector<8x64xf32>
    %144 = arith.subf %134, %143 : vector<8x64xf32>
    %145 = arith.mulf %144, %144 : vector<8x64xf32>
    %cst_63 = arith.constant dense<0.000000e+00> : vector<8xf32>
    %146 = vector.multi_reduction <add>, %145, %cst_63 [1] : vector<8x64xf32> to vector<8xf32>
    %147 = vector.shape_cast %146 : vector<8xf32> to vector<8x1xf32>
    %cst_64 = arith.constant 6.400000e+01 : f32
    %148 = vector.broadcast %cst_64 : f32 to vector<8x1xf32>
    %149 = arith.divf %147, %148 : vector<8x1xf32>
    %150 = vector.broadcast %142 : vector<8x1xf32> to vector<8x64xf32>
    %151 = arith.subf %134, %150 : vector<8x64xf32>
    %cst_65 = arith.constant 9.99999996E-13 : f32
    %152 = vector.broadcast %cst_65 : f32 to vector<8x1xf32>
    %153 = arith.addf %149, %152 : vector<8x1xf32>
    %154 = math.rsqrt %153 : vector<8x1xf32>
    %155 = vector.broadcast %154 : vector<8x1xf32> to vector<8x64xf32>
    %156 = arith.mulf %151, %155 : vector<8x64xf32>
    %157 = vector.broadcast %136 : vector<1x64xf32> to vector<8x64xf32>
    %158 = arith.mulf %156, %157 : vector<8x64xf32>
    %159 = vector.broadcast %138 : vector<1x64xf32> to vector<8x64xf32>
    %160 = arith.addf %158, %159 : vector<8x64xf32>
    %c0_66 = arith.constant 0 : index
    %c0_67 = arith.constant 0 : index
    %161 = vector.load %arg20[%c0_66, %c0_67] : memref<8x64xf32, #tpu.memory_space<vmem>>, vector<8x64xf32>
    tpu.vector_store %arg20[%c0_66, %c0_67], %160 {strides = array<i32>} : memref<8x64xf32, #tpu.memory_space<vmem>>, vector<8x64xf32>,
    %c1_i32 = arith.constant 1 : i32
    %162 = arith.cmpi eq, %arg1, %c1_i32 : i32
    %163 = arith.extui %162 : i1 to i32
    %c0_i32_68 = arith.constant 0 : i32
    %164 = arith.cmpi ne, %163, %c0_i32_68 : i32
    scf.if %164 {
      %c0_69 = arith.constant 0 : index
      %c0_70 = arith.constant 0 : index
      %c0_71 = arith.constant 0 : index
      %165 = vector.load %arg4[%c0_69, %c0_70, %c0_71] : memref<1x1x8xf32, #tpu.memory_space<vmem>>, vector<1x1x8xf32>
      %166 = vector.shape_cast %165 : vector<1x1x8xf32> to vector<1x8xf32>
      %cst_72 = arith.constant dense<0.000000e+00> : vector<1x64xf32>
      %167 = tpu.matmul %166, %160, %cst_72 {dimension_numbers = #tpu.dot_dimension_numbers<[1], [0], [0], [1], [0, 0, 1, 1], [], []>} : vector<1x8xf32>, vector<8x64xf32>, vector<1x64xf32> -> vector<1x64xf32>
      %cst_73 = arith.constant dense<0.000000e+00> : vector<1xf32>
      %168 = vector.multi_reduction <add>, %166, %cst_73 [1] : vector<1x8xf32> to vector<1xf32>
      %169 = vector.shape_cast %168 : vector<1xf32> to vector<1x1xf32>
      %cst_74 = arith.constant 1.000000e+00 : f32
      %170 = vector.broadcast %cst_74 : f32 to vector<1x1xf32>
      %171 = arith.maximumf %169, %170 : vector<1x1xf32>
      %172 = vector.broadcast %171 : vector<1x1xf32> to vector<1x64xf32>
      %173 = arith.divf %167, %172 : vector<1x64xf32>
      %c0_75 = arith.constant 0 : index
      %c0_76 = arith.constant 0 : index
      %174 = vector.load %arg17[%c0_75, %c0_76] : memref<1x64xf32, #tpu.memory_space<vmem>>, vector<1x64xf32>
      %175 = arith.mulf %173, %174 : vector<1x64xf32>
      %cst_77 = arith.constant dense<0.000000e+00> : vector<1xf32>
      %176 = vector.multi_reduction <add>, %175, %cst_77 [1] : vector<1x64xf32> to vector<1xf32>
      %177 = vector.shape_cast %176 : vector<1xf32> to vector<1x1xf32>
      %c0_78 = arith.constant 0 : index
      %c0_79 = arith.constant 0 : index
      %178 = vector.load %arg18[%c0_78, %c0_79] : memref<1x1xf32, #tpu.memory_space<vmem>>, vector<1x1xf32>
      %179 = arith.addf %177, %178 : vector<1x1xf32>
      %180 = arith.negf %179 : vector<1x1xf32>
      %181 = math.exp %180 : vector<1x1xf32>
      %cst_80 = arith.constant 1.000000e+00 : f32
      %182 = vector.broadcast %cst_80 : f32 to vector<1x1xf32>
      %183 = arith.addf %182, %181 : vector<1x1xf32>
      %184 = arith.divf %182, %183 : vector<1x1xf32>
      %185 = vector.shape_cast %184 : vector<1x1xf32> to vector<1x1x1xf32>
      %c0_81 = arith.constant 0 : index
      %c0_82 = arith.constant 0 : index
      %c0_83 = arith.constant 0 : index
      %186 = vector.load %arg19[%c0_81, %c0_82, %c0_83] : memref<1x1x1xf32, #tpu.memory_space<vmem>>, vector<1x1x1xf32>
      tpu.vector_store %arg19[%c0_81, %c0_82, %c0_83], %185 {strides = array<i32>} : memref<1x1x1xf32, #tpu.memory_space<vmem>>, vector<1x1x1xf32>,
    } else {
    }
    return
  }
  func.func @transform_0(%arg0: i32, %arg1: i32) -> (i32, i32, i32) {
    %c0_i32 = arith.constant 0 : i32
    %c0_i32_0 = arith.constant 0 : i32
    %c0_i32_1 = arith.constant 0 : i32
    return %arg0, %c0_i32, %c0_i32_0 : i32, i32, i32
  }
  func.func @transform_1(%arg0: i32, %arg1: i32) -> (i32, i32, i32) {
    %c0_i32 = arith.constant 0 : i32
    %c0_i32_0 = arith.constant 0 : i32
    %c0_i32_1 = arith.constant 0 : i32
    return %arg0, %c0_i32, %c0_i32_0 : i32, i32, i32
  }
  func.func @transform_2(%arg0: i32, %arg1: i32) -> (i32, i32, i32) {
    %c0_i32 = arith.constant 0 : i32
    %c0_i32_0 = arith.constant 0 : i32
    %c0_i32_1 = arith.constant 0 : i32
    return %arg0, %c0_i32, %c0_i32_0 : i32, i32, i32
  }
  func.func @transform_3(%arg0: i32, %arg1: i32) -> (i32, i32, i32, i32) {
    %c0_i32 = arith.constant 0 : i32
    %c0_i32_0 = arith.constant 0 : i32
    %c0_i32_1 = arith.constant 0 : i32
    %c0_i32_2 = arith.constant 0 : i32
    return %arg1, %c0_i32, %c0_i32_0, %c0_i32_1 : i32, i32, i32, i32
  }
  func.func @transform_4(%arg0: i32, %arg1: i32) -> (i32, i32, i32, i32) {
    %c0_i32 = arith.constant 0 : i32
    %c0_i32_0 = arith.constant 0 : i32
    %c0_i32_1 = arith.constant 0 : i32
    %c0_i32_2 = arith.constant 0 : i32
    return %arg1, %c0_i32, %c0_i32_0, %c0_i32_1 : i32, i32, i32, i32
  }
  func.func @transform_5(%arg0: i32, %arg1: i32) -> (i32, i32, i32) {
    %c0_i32 = arith.constant 0 : i32
    %c0_i32_0 = arith.constant 0 : i32
    %c0_i32_1 = arith.constant 0 : i32
    return %arg1, %c0_i32, %c0_i32_0 : i32, i32, i32
  }
  func.func @transform_6(%arg0: i32, %arg1: i32) -> (i32, i32, i32) {
    %c0_i32 = arith.constant 0 : i32
    %c0_i32_0 = arith.constant 0 : i32
    %c0_i32_1 = arith.constant 0 : i32
    return %arg1, %c0_i32, %c0_i32_0 : i32, i32, i32
  }
  func.func @transform_7(%arg0: i32, %arg1: i32) -> (i32, i32, i32) {
    %c0_i32 = arith.constant 0 : i32
    %c0_i32_0 = arith.constant 0 : i32
    %c0_i32_1 = arith.constant 0 : i32
    return %arg1, %c0_i32, %c0_i32_0 : i32, i32, i32
  }
  func.func @transform_8(%arg0: i32, %arg1: i32) -> (i32, i32, i32) {
    %c0_i32 = arith.constant 0 : i32
    %c0_i32_0 = arith.constant 0 : i32
    %c0_i32_1 = arith.constant 0 : i32
    return %arg1, %c0_i32, %c0_i32_0 : i32, i32, i32
  }
  func.func @transform_9(%arg0: i32, %arg1: i32) -> (i32, i32, i32) {
    %c0_i32 = arith.constant 0 : i32
    %c0_i32_0 = arith.constant 0 : i32
    %c0_i32_1 = arith.constant 0 : i32
    return %arg1, %c0_i32, %c0_i32_0 : i32, i32, i32
  }
  func.func @transform_10(%arg0: i32, %arg1: i32) -> (i32, i32, i32) {
    %c0_i32 = arith.constant 0 : i32
    %c0_i32_0 = arith.constant 0 : i32
    %c0_i32_1 = arith.constant 0 : i32
    return %arg1, %c0_i32, %c0_i32_0 : i32, i32, i32
  }
  func.func @transform_11(%arg0: i32, %arg1: i32) -> (i32, i32, i32) {
    %c0_i32 = arith.constant 0 : i32
    %c0_i32_0 = arith.constant 0 : i32
    %c0_i32_1 = arith.constant 0 : i32
    return %arg1, %c0_i32, %c0_i32_0 : i32, i32, i32
  }
  func.func @transform_12(%arg0: i32, %arg1: i32) -> (i32, i32, i32) {
    %c0_i32 = arith.constant 0 : i32
    %c0_i32_0 = arith.constant 0 : i32
    %c0_i32_1 = arith.constant 0 : i32
    return %arg1, %c0_i32, %c0_i32_0 : i32, i32, i32
  }
  func.func @transform_13(%arg0: i32, %arg1: i32) -> (i32, i32, i32) {
    %c0_i32 = arith.constant 0 : i32
    %c0_i32_0 = arith.constant 0 : i32
    %c0_i32_1 = arith.constant 0 : i32
    return %arg1, %c0_i32, %c0_i32_0 : i32, i32, i32
  }
  func.func @transform_14(%arg0: i32, %arg1: i32) -> (i32, i32, i32) {
    %c0_i32 = arith.constant 0 : i32
    %c0_i32_0 = arith.constant 0 : i32
    %c0_i32_1 = arith.constant 0 : i32
    return %arg1, %c0_i32, %c0_i32_0 : i32, i32, i32
  }
  func.func @transform_15(%arg0: i32, %arg1: i32) -> (i32, i32) {
    %c0_i32 = arith.constant 0 : i32
    %c0_i32_0 = arith.constant 0 : i32
    %c0_i32_1 = arith.constant 0 : i32
    return %c0_i32, %c0_i32_0 : i32, i32
  }
  func.func @transform_16(%arg0: i32, %arg1: i32) -> (i32, i32) {
    %c0_i32 = arith.constant 0 : i32
    %c0_i32_0 = arith.constant 0 : i32
    %c0_i32_1 = arith.constant 0 : i32
    return %c0_i32, %c0_i32_0 : i32, i32
  }
  func.func @transform_17(%arg0: i32, %arg1: i32) -> (i32, i32, i32) {
    %c0_i32 = arith.constant 0 : i32
    %c0_i32_0 = arith.constant 0 : i32
    %c0_i32_1 = arith.constant 0 : i32
    return %arg0, %c0_i32, %c0_i32_0 : i32, i32, i32
  }
}

</mosaic_0001>

<bundles_post_ra>
// kernel: tpu_custom_call.1
= control target key start
LH: loop header
LB: loop body
LE: loop exit
PB: predicated region body
PF: predicated region fallthrough
CT: control target
= control target key end

     0   :  { %s3237_s0 = inlined_call_operand.hbm [shape: f32[2,8,64], index: 0, kind: input, shape index: {}]   ;;  %s3238_s1 = inlined_call_operand.vmem [shape: f32[2,1,8], index: 1, kind: input, shape index: {}]   ;;  %s3239_s2 = inlined_call_operand.vmem [shape: f32[2,1,8], index: 2, kind: input, shape index: {}]   ;;  %s3240_s3 = inlined_call_operand.vmem [shape: bf16[2,3,64,64], index: 3, kind: input, shape index: {}]   ;;  %s3241_s4 = inlined_call_operand.vmem [shape: f32[2,3,1,64], index: 4, kind: input, shape index: {}]   ;;  %s3242_s5 = inlined_call_operand.hbm [shape: bf16[2,64,64], index: 5, kind: input, shape index: {}]   ;;  %s3243_s6 = inlined_call_operand.vmem [shape: f32[2,1,64], index: 6, kind: input, shape index: {}]   ;;  %s3244_s7 = inlined_call_operand.vmem [shape: f32[2,1,64], index: 7, kind: input, shape index: {}]   ;;  %s3245_s8 = inlined_call_operand.vmem [shape: f32[2,1,64], index: 8, kind: input, shape index: {}]   ;;  %s3246_s9 = inlined_call_operand.hbm [shape: bf16[2,64,128], index: 9, kind: input, shape index: {}]   ;;  %s3247_s10 = inlined_call_operand.vmem [shape: f32[2,1,128], index: 10, kind: input, shape index: {}]   ;;  %s3248_s11 = inlined_call_operand.vmem [shape: bf16[2,128,64], index: 11, kind: input, shape index: {}]   ;;  %s3249_s12 = inlined_call_operand.vmem [shape: f32[2,1,64], index: 12, kind: input, shape index: {}]   ;;  %s3250_s13 = inlined_call_operand.vmem [shape: f32[2,1,64], index: 13, kind: input, shape index: {}]   ;;  %s3251_s14 = inlined_call_operand.vmem [shape: f32[2,1,64], index: 14, kind: input, shape index: {}]   ;;  %s3252_s15 = inlined_call_operand.vmem [shape: f32[1,64], index: 15, kind: input, shape index: {}]   ;;  %s3253_s16 = inlined_call_operand.<no memory space> [shape: f32[1,1], index: 16, kind: input, shape index: {}]   ;;  %s3254_s17 = inlined_call_operand.vmem [shape: f32[2,1,1], index: 17, kind: output, shape index: {}]  }
   0x1   :  { %3274 = sst [smem:[#allocation22_spill]] %s3237_s0  ;;  %v22_v0 = vstv %s3253_s16 }
   0x2   :  { %3275 = sst [smem:[#allocation23_spill]] %s3238_s1  ;;  %23 = vst [vmem:[#allocation3] sm:$0x1] %v22_v0 }
   0x3   :  { %3276 = sst [smem:[#allocation24_spill]] %s3239_s2 }
   0x4   :  { %3277 = sst [smem:[#allocation25_spill]] %s3240_s3 }
   0x5   :  { %3278 = sst [smem:[#allocation26_spill]] %s3241_s4 }
   0x6   :  { %3279 = sst [smem:[#allocation27_spill]] %s3242_s5 }
   0x7   :  { %3280 = sst [smem:[#allocation28_spill]] %s3244_s7 }
   0x8   :  { %3281 = sst [smem:[#allocation29_spill]] %s3245_s8 }
   0x9   :  { %3282 = sst [smem:[#allocation30_spill]] %s3246_s9 }
   0xa   :  { %3283 = sst [smem:[#allocation31_spill]] %s3247_s10 }
   0xb   :  { %3284 = sst [smem:[#allocation32_spill]] %s3248_s11 }
   0xc   :  { %3285 = sst [smem:[#allocation33_spill]] %s3249_s12 }
   0xd   :  { %3286 = sst [smem:[#allocation34_spill]] %s3250_s13 }
   0xe   :  { %3287 = sst [smem:[#allocation35_spill]] %s3251_s14 }
   0xf   :  { %3288 = sst [smem:[#allocation36_spill]] %s3252_s15 }
  0x10   :  { %3289 = sst [smem:[#allocation37_spill]] %s3254_s17 }
  0x11   :  { %24 = vsyncpa [#allocation5], 0 }
  0x12   :  { %26 = vsyncpa [#allocation5 + $0x1], 0 }
  0x13   :  { %27 = vsyncpa [#allocation7], 0 }
  0x14   :  { %29 = vsyncpa [#allocation7 + $0x1], 0  ;;  %s2690_s26 = smov 0   ;;  %s2692_s27 = smov 0  }
  0x15   :  { %s2694_s28 = smov 0   ;;  %s2696_s29 = smov 0  }
  0x16   :  { %s2698_s0 = smov 0   ;;  %s2700_s30 = smov 0  }
  0x17   :  { %s2702_s18 = smov 0   ;;  %s2704_s16 = smov 0  }
  0x18   :  { %s2706_s19 = smov 0   ;;  %s2708_s1 = smov 0  }
  0x19   :  { %s2710_s20 = smov 0  }
  0x1a LB: > { %3290 = sst [smem:[#allocation11_spill]] %s2548_s27  ;;  %s44_s21 = sadd.s32 1, %s2576_s19  ;;  %s2584_s20 = sphi %s2710_s20, %s35_s20   ;;  %s2580_s1 = sphi %s2708_s1, %s3360_s1   ;;  %s2576_s19 = sphi %s2706_s19, %s3359_s19   ;;  %s2572_s16 = sphi %s2704_s16, %s3358_s16   ;;  %s2568_s18 = sphi %s2702_s18, %s3357_s18   ;;  %s2564_s30 = sphi %s2700_s30, %s3356_s30   ;;  %s2560_s0 = sphi %s2698_s0, %s3355_s0   ;;  %s2556_s29 = sphi %s2696_s29, %s3354_s29   ;;  %s2552_s28 = sphi %s2694_s28, %s3353_s28   ;;  %s2548_s27 = sphi %s2692_s27, %s3352_s27   ;;  %s2544_s26 = sphi %s2690_s26, %s3351_s26  }
  0x1b   : > { %3291 = sst [smem:[#allocation12_spill]] %s2552_s28  ;;  %p3260_p0 = scmp.eq.s32.totalorder %s2584_s20, 0 }
  0x1c   : > { %3292 = sst [smem:[#allocation13_spill]] %s2560_s0  ;;  %p2747_p1 = scmp.ge.s32.totalorder %s44_s21, 2 }
  0x1d   : > { %3293 = sst [smem:[#allocation14_spill]] %s2564_s30  ;;  %s184_s23 = sadd.s32 1, %s2552_s28 }
  0x1e   : > { %3294 = sst [smem:[#allocation15_spill]] %s2576_s19  ;;  %p191_p2 = scmp.ne.s32.totalorder %s2552_s28, %s2548_s27 }
  0x1f   : > { %3295 = sst [smem:[#allocation16_spill]] %s2580_s1  ;;  %s3362_s21 = smov (%p2747_p1, %s44_s21), 0 }
  0x20   : > { %3296 = sst [smem:[#allocation17_spill]] %s2584_s20  ;;  %p193_p4 = por %p191_p2, %p3260_p0 }
  0x21   : > { %3298 = sst [smem:[#allocation18_spill]] %s3362_s21  ;;  %s181_s24 = ssub.s32 %s2576_s19, %s3362_s21 }
  0x22   : > { %p3259_p5 = scmp.lt.s32.totalorder %s2584_s20, 4  ;;  %p182_p6 = scmp.eq.s32.totalorder %s181_s24, 0 }
  0x23   : > { %s574_s25 = sand.u32 1, %s2584_s20   ;;  %s576_s15 = sand.u32 1, %s2552_s28  }
  0x24   : > { %s2768_s17 = scalar_select %p182_p6, %s2552_s28, %s184_s23  }
  0x25   : > { %s2770_s14 = sshll.u32 %s576_s15, 5  ;;  %s3257_s13 = sshll.u32 %s2576_s19, 9 }
  0x26   : > { %3299 = sst [smem:[#allocation19_spill]] %s2768_s17  ;;  %s3300_s5 = sld [smem:[#allocation27_spill]] }
  0x27   : > { %s578_s21 = scalar_lea.vmem [#allocation6], %s2770_s14  ;;  %p2783_p7 = pnand %p3259_p5, %p193_p4 }
  0x28   : > { %s585_s24 = sshll.u32 %s578_s21, 4  ;;  %s2789_s15 = scalar_lea.sflag [#allocation7], %s574_s25  ;;  %s2787_s24 = int_to_ptr.vmem [resolvable:$true] %s585_s24 }
  0x29   : > { %p2402_p9 = pneg %p2783_p7 }
  0x2c   : > { %s2778_s10 = scalar_lea.hbm %s3300_s5, %s3257_s13  ;;  %s2405_s13 = scalar_lea.hbm %s3300_s5, 1024 }
  0x2d   : > { %s2400_s11 = scalar_lea.hbm %s2778_s10, 512  ;;  %p2406_p12 = scmp.lt.u32.totalorder %s2778_s10, %s3300_s5 }
  0x2e   : > { %p2401_p8 = scmp.ne.s32.totalorder %s2778_s10, %s2400_s11  ;;  %p2407_p13 = scmp.lt.u32.totalorder %s2405_s13, %s2400_s11 }
  0x2f   : > { %p2409_p4 = scmp.lt.u32.totalorder %s2400_s11, %s2778_s10 }
  0x30   : > { %p2403_p10 = pnand %p2402_p9, %p2401_p8  ;;  %p2408_p2 = por %p2407_p13, %p2406_p12 }
  0x32   : > { %p2404_p11 = pneg %p2403_p10  ;;  %p2410_p6 = por %p2409_p4, %p2408_p2 }
  0x34   : > { %p2411_p5 = pnand %p2410_p6, %p2404_p11 }
  0x36   : > { %2414 = shalt.err (!%p2411_p5)
}
  0x37   : > { %s2415_s25 = scalar_lea.vmem %s2787_s24, 512  ;;  %s2586_s12 = smov [#allocation6]  }
  0x38   : > { %p2416_p8 = scmp.ne.s32.totalorder %s2787_s24, %s2415_s25  ;;  %s2420_s21 = sshll.u32 %s2586_s12, 4  ;;  %s2421_s21 = int_to_ptr.vmem [resolvable:$false] %s2420_s21 }
  0x39   : > { %s2422_s17 = scalar_lea.vmem %s2421_s21, 1024  ;;  %p2423_p0 = scmp.lt.s32.totalorder %s2787_s24, %s2421_s21 }
  0x3a   : > { %p2418_p10 = pnand %p2416_p8, %p2402_p9  ;;  %p2424_p12 = scmp.lt.s32.totalorder %s2422_s17, %s2415_s25 }
  0x3c   : > { %p2419_p3 = pneg %p2418_p10  ;;  %p2425_p13 = por %p2424_p12, %p2423_p0 }
  0x3e   : > { %p2426_p2 = pnand %p2425_p13, %p2419_p3 }
  0x40   : > { %2429 = shalt.err (!%p2426_p2)
}
  0x41   : > { %s3262_s13 = smov 64   ;;  %s3263_s28 = smov 4  }
  0x42   : > { %2251 = dma.hbm_to_vmem [thread:$0]  (!%p2783_p7), %s2778_s10, 512, %s2787_s24, %s2789_s15, %s3262_s13, %s3262_s13, %s3263_s28  }
  0x43   : > { %s3302_s11 = sshll.u32 %s2576_s19, 9  ;;  %s3303_s9 = sld [smem:[#allocation30_spill]] }
  0x44   : > { %s617_s17 = scalar_lea.vmem [#allocation8], %s2770_s14  ;;  %p2020_p0 = scmp.ge.s32.totalorder %s2584_s20, 1 }
  0x45   : > { %s624_s5 = sshll.u32 %s617_s17, 4  ;;  %p664_p3 = scmp.lt.s32.totalorder %s2584_s20, 5  ;;  %s2829_s5 = int_to_ptr.vmem [resolvable:$true] %s624_s5 }
  0x46   : > { %s3261_s10 = sadd.s32 4294967295, %s2584_s20   ;;  %s47_s24 = sadd.s32 1, %s2580_s1 }
  0x47   : > { %p2832_p5 = pnand %p2020_p0, %p664_p3  ;;  %s3364_s24 = smov (!%p2747_p1, %s47_s24), %s2580_s1 }
  0x48   : > { %p61_p11 = scmp.ne.s32.totalorder %s2564_s30, %s2560_s0  ;;  %p67_p4 = scmp.ne.s32.totalorder %s2560_s0, %s2556_s29 }
  0x49   : > { %s2825_s21 = scalar_lea.hbm %s3303_s9, %s3302_s11  ;;  %s54_s11 = sadd.s32 1, %s2564_s30 }
  0x4a   : > { %s3304_s4 = scalar_select %p2832_p5, 1, 0 }
  0x4b   : > { %p49_p6 = scmp.ge.s32.totalorder %s3364_s24, 2  ;;  %p68_p8 = scmp.eq.s32.totalorder %s3261_s10, 0 }
  0x4c   : > { %p3305_p10 = scmp.eq.s32.totalorder %s2584_s20, 0  ;;  %s529_s25 = sand.u32 1, %s2564_s30  }
  0x4d   : > { %s3366_s24 = smov (%p49_p6, %s3364_s24), 0  ;;  %p2857_p1 = por %p68_p8, %p67_p4 }
  0x4e   : > { %p2850_p12 = por %p3305_p10, %p61_p11  ;;  %3307 = sst [smem:[#allocation20_spill]] %s3366_s24 }
  0x4f   : > { %s3308_s22 = scalar_select %p2857_p1, 1, 0 }
  0x50   : > { %p3309_p13 = scmp.ne.s32.totalorder %s2548_s27, %s2544_s26  ;;  %s51_s12 = ssub.s32 %s2580_s1, %s3366_s24 }
  0x51   : > { %p52_p0 = scmp.eq.s32.totalorder %s51_s12, 0  ;;  %s2012_s17 = sshll.u32 %s529_s25, 3 }
  0x52   : > { %p2864_p2 = por %p3309_p13, %p68_p8  ;;  %s2013_s10 = sshll.u32 %s2580_s1, 7 }
  0x53   : > { %s2874_s13 = scalar_select %p52_p0, %s2564_s30, %s54_s11  }
  0x54   : > { %s3310_s29 = scalar_select %p2864_p2, 1, 0 }
  0x55   : > { %3311 = sst [smem:[#allocation21_spill]] %s2874_s13  ;;  %s3312_s8 = sld [smem:[#allocation22_spill]] }
  0x56   : > { %s533_s7 = scalar_lea.vmem [#allocation4], %s2012_s17  ;;  %p3313_p3 = scmp.lt.s32.totalorder %s2584_s20, 4 }
  0x57   : > { %s540_s26 = sshll.u32 %s533_s7, 4  ;;  %s2430_s12 = scalar_lea.hbm %s2825_s21, 512  ;;  %s2881_s26 = int_to_ptr.vmem [resolvable:$true] %s540_s26 }
  0x58   : > { %p2887_p11 = pnand %p3313_p3, %p2850_p12  ;;  %p2431_p4 = scmp.ne.s32.totalorder %s2825_s21, %s2430_s12 }
  0x59   : > { %s2435_s28 = scalar_lea.hbm %s3303_s9, 1024  ;;  %p2436_p10 = scmp.lt.u32.totalorder %s2825_s21, %s3303_s9 }
  0x5a   : > { %p2433_p6 = pnand %p2431_p4, %p2402_p9  ;;  %p2437_p13 = scmp.lt.u32.totalorder %s2435_s28, %s2430_s12 }
  0x5b   : > { %s2879_s3 = scalar_lea.hbm %s3312_s8, %s2013_s10  ;;  %p2439_p12 = scmp.lt.u32.totalorder %s2430_s12, %s2825_s21 }
  0x5c   : > { %p2434_p8 = pneg %p2433_p6  ;;  %p2438_p0 = por %p2437_p13, %p2436_p10 }
  0x5e   : > { %p2440_p3 = por %p2439_p12, %p2438_p0 }
  0x60   : > { %p2441_p2 = pnand %p2440_p3, %p2434_p8 }
  0x62   : > { %2444 = shalt.err (!%p2441_p2)
}
  0x63   : > { %s2445_s14 = scalar_lea.vmem %s2829_s5, 512  ;;  %s2589_s17 = smov [#allocation8]  }
  0x64   : > { %p2446_p4 = scmp.ne.s32.totalorder %s2829_s5, %s2445_s14  ;;  %s2450_s11 = sshll.u32 %s2589_s17, 4  ;;  %s2451_s11 = int_to_ptr.vmem [resolvable:$false] %s2450_s11 }
  0x65   : > { %s2452_s19 = scalar_lea.vmem %s2451_s11, 1024  ;;  %p2453_p5 = scmp.lt.s32.totalorder %s2829_s5, %s2451_s11 }
  0x66   : > { %p2448_p6 = pnand %p2446_p4, %p2402_p9  ;;  %p2454_p10 = scmp.lt.s32.totalorder %s2452_s19, %s2445_s14 }
  0x68   : > { %p2449_p1 = pneg %p2448_p6  ;;  %p2455_p13 = por %p2454_p10, %p2453_p5 }
  0x6a   : > { %p2456_p0 = pnand %p2455_p13, %p2449_p1 }
  0x6c   : > { %2459 = shalt.err (!%p2456_p0)
}
  0x6d   : > { %s3315_s12 = smov 4   ;;  %s3316_s28 = smov 64  }
  0x6e   : > { %2254 = dma.hbm_to_vmem [thread:$0]  (!%p2783_p7), %s2825_s21, 512, %s2829_s5, %s2789_s15, %s3316_s28, %s3316_s28, %s3315_s12  }
  0x6f   : > { %s530_s10 = scalar_lea.sflag [#allocation5], %s529_s25  ;;  %s2460_s7 = scalar_lea.hbm %s2879_s3, 128 }
  0x70   : > { %p2461_p9 = scmp.ne.s32.totalorder %s2879_s3, %s2460_s7  ;;  %p2462_p5 = pneg %p2887_p11 }
  0x71   : > { %s2465_s17 = scalar_lea.hbm %s3312_s8, 256  ;;  %p2466_p8 = scmp.lt.u32.totalorder %s2879_s3, %s3312_s8 }
  0x72   : > { %p2463_p1 = pnand %p2462_p5, %p2461_p9  ;;  %p2467_p12 = scmp.lt.u32.totalorder %s2465_s17, %s2460_s7 }
  0x73   : > { %p2469_p3 = scmp.lt.u32.totalorder %s2460_s7, %s2879_s3 }
  0x74   : > { %p2464_p2 = pneg %p2463_p1  ;;  %p2468_p7 = por %p2467_p12, %p2466_p8 }
  0x76   : > { %p2470_p4 = por %p2469_p3, %p2468_p7 }
  0x78   : > { %p2471_p6 = pnand %p2470_p4, %p2464_p2 }
  0x7a   : > { %2474 = shalt.err (!%p2471_p6)
}
  0x7b   : > { %s2475_s5 = scalar_lea.vmem %s2881_s26, 128  ;;  %s2590_s15 = smov [#allocation4]  }
  0x7c   : > { %p2476_p10 = scmp.ne.s32.totalorder %s2881_s26, %s2475_s5  ;;  %s2480_s21 = sshll.u32 %s2590_s15, 4  ;;  %s2481_s21 = int_to_ptr.vmem [resolvable:$false] %s2480_s21 }
  0x7d   : > { %s2482_s25 = scalar_lea.vmem %s2481_s21, 256  ;;  %p2483_p9 = scmp.lt.s32.totalorder %s2881_s26, %s2481_s21 }
  0x7e   : > { %p2478_p13 = pnand %p2476_p10, %p2462_p5  ;;  %p2484_p1 = scmp.lt.s32.totalorder %s2482_s25, %s2475_s5 }
  0x80   : > { %p2479_p0 = pneg %p2478_p13  ;;  %p2485_p8 = por %p2484_p1, %p2483_p9 }
  0x82   : > { %p2486_p12 = pnand %p2485_p8, %p2479_p0 }
  0x84   : > { %2489 = shalt.err (!%p2486_p12)
}
  0x85   : > { %2248 = dma.hbm_to_vmem [thread:$0]  (!%p2887_p11), %s2879_s3, 128, %s2881_s26, %s530_s10  }
  0x86   : > { %p3317_p2 = scmp.ne.s32.totalorder %s3304_s4, 0 }
  0x87   : > { %s670_s12 = sand.u32 (!%p3317_p2), 1, %s2560_s0   ;;  %p3318_p5 = scmp.ne.s32.totalorder (!%p3317_p2), %s3308_s22, 0 }
  0x88   : > { %668 = sbr.rel (%p3317_p2) target bundleno = 3090 (0xc12), region = 88  ;;  %s2948_s28 = sshll.u32 (!%p3317_p2), %s670_s12, 3 }
  0x89   : > { %s671_s7 = scalar_lea.sflag (!%p3317_p2), [#allocation5], %s670_s12 }
  0x8f   : > { %2535 = dma.done.wait (%p3318_p5), %s671_s7, 128  }
  0x90   : > { %2537 = vsyncadd (%p3318_p5), %s671_s7, 4294967168  ;;  %s3319_s24 = sadd.s32 4294967295, %s2584_s20   ;;  %s681_s4 = sand.u32 1, %s2548_s27  }
  0x91   : > { %s679_s3 = sand.u32 1, %s3319_s24   ;;  %s2022_s26 = sshll.u32 %s681_s4, 5 }
  0x92   : > { %s680_s10 = scalar_lea.sflag [#allocation7], %s679_s3  ;;  %s2958_s14 = scalar_lea.vmem [#allocation6], %s2022_s26 }
  0x93   : > { %p3320_p11 = scmp.ne.s32.totalorder %s3310_s29, 0 }
  0x95   : > { %2539 = dma.done.wait (%p3320_p11), %s680_s10, 1024  }
  0x96   : > { %2541 = vsyncadd (%p3320_p11), %s680_s10, 4294966272  ;;  %p792_p7 = scmp.lt.s32.totalorder %s2572_s16, 1  ;;  %p798_p3 = scmp.lt.s32.totalorder %s2568_s18, 1 }
  0x97   : > { %s3324_s9 = sld [smem:[#allocation25_spill]]  ;;  %s3326_s30 = sld [smem:[#allocation26_spill]] }
  0x98   : > { %s3368_s16 = smov (!%p792_p7, %s2572_s16), 1  ;;  %s3328_s11 = sld [smem:[#allocation33_spill]] }
  0x99   : > { %s2970_s22 = scalar_select %p798_p3, %s2568_s18, 1 }
  0x9a   : > { %s3330_s19 = sld [smem:[#allocation34_spill]]  ;;  %s3331_s15 = sld [smem:[#allocation35_spill]] }
  0x9b   : > { %s2237_s25 = smul.u32 96, %s2970_s22  ;;  %s2083_s4 = sshll.u32 %s2970_s22, 6 }
  0x9c   : > { %s2238_s3 = smul.u32 3, %s2970_s22  ;;  %s3332_s7 = sld [smem:[#allocation37_spill]] }
  0x9d   : > { %s2993_s1 = scalar_lea.vmem %s3324_s9, %s2237_s25  ;;  %s3329_s25 = sld [smem:[#allocation32_spill]] }
  0x9e   : > { %s3002_s0 = scalar_lea.vmem %s3326_s30, %s2238_s3  ;;  %s826_s8 = scalar_lea.vmem %s3328_s11, %s2970_s22 }
  0x9f   : > { %s3030_s2 = scalar_lea.vmem [#allocation8], %s2022_s26  ;;  %p2027_p4 = scmp.ne.s32.totalorder %s2568_s18, 0 }
  0xa0   : > { %s829_s21 = scalar_lea.vmem %s3330_s19, %s2970_s22  ;;  %s832_s5 = scalar_lea.vmem %s3331_s15, %s2970_s22  ;;  %vm842_vm0 = vcmask (!%p2027_p4), 523264  }
  0xa1   : > { %840 = sbr.rel (%p2027_p4) target bundleno = 168 (0xa8), region = 104  ;;  %s3333_s11 = scalar_lea.vmem (!%p2027_p4), [#allocation4], %s2948_s28 }
  0xa2   : > { %s835_s27 = scalar_lea.vmem %s3332_s7, %s3368_s16  ;;  %v841_v1 = vld [vmem:[%s3333_s11] sm:$0xff] (!%p2027_p4) }
  0xa3   : > { %s3016_s20 = scalar_lea.vmem %s3329_s25, %s2083_s4  ;;  %843 = vst.msk [vmem:[#allocation2] sm:$0xff] (!%p2027_p4), %vm842_vm0, %v841_v1 }
  0xa8 PF: > { %v2352_v2 = vld [vmem:[%s2993_s1] sm:$0xff]   ;;  %v2591_v3 = vmov 0.0   ;;  %v2353_v4 = vld [vmem:[%s2993_s1 + $0x8] sm:$0xff]   ;;  %vm2592_vm1 = vmmov 0   ;;  %v2354_v5 = vld [vmem:[%s2993_s1 + $0x10] sm:$0xff]   ;;  %vm903_vm2 = vcmask 523264   ;;  %s3336_s9 = scalar_lea.vmem %s3243_s6, %s2970_s22 }
  0xa9   : > { %2128 = vmatprep.subr.bf16.mxu1 %v2591_v3  ;;  %2152 = vmatprep.subr.bf16.mxu0 %v2591_v3  ;;  %v2355_v6 = vld [vmem:[%s2993_s1 + $0x18] sm:$0xff]   ;;  %v2356_v8 = vld [vmem:[%s2993_s1 + $0x20] sm:$0xff]   ;;  %v2357_v10 = vld [vmem:[%s2993_s1 + $0x28] sm:$0xff]   ;;  %vm1112_vm3 = vcmask 261120   ;;  %s2593_s28 = smov 96   ;;  %s3334_s4 = sld [smem:[#allocation23_spill]] }
  0xaa   : > { %2129 = vmatpush3.bf16.msra.mxu1 %v2352_v2  ;;  %2136 = vmatprep.mubr.msk.bf16.mxu1 %vm2592_vm1, %v2591_v3  ;;  %v3047_v7 = vld [vmem:[#allocation2] sm:$0xff]  ;;  %v2358_v11 = vld [vmem:[%s2993_s1 + $0x30] sm:$0xff]   ;;  %v2359_v12 = vld [vmem:[%s2993_s1 + $0x38] sm:$0xff]   ;;  %vm1205_vm4 = vcmask 64512   ;;  %vm1233_vm5 = vcmask 1043456   ;;  %s3337_s13 = sld [smem:[#allocation28_spill]] }
  0xab   : > { %2130 = vmatprep.subr.bf16.mxu1 %v2591_v3  ;;  %2160 = vmatprep.mubr.msk.bf16.mxu0 %vm2592_vm1, %v2591_v3  ;;  %v845_v9 = vpack.c.bf16 %v3047_v7, %v3047_v7  ;;  %v2034_v17 = vld [vmem:[%s3002_s0 + $0x1] ss:$0 sm:$0xff]  ;;  %v2028_v21 = vld [vmem:[%s3002_s0] ss:$0 sm:$0xff]  ;;  %v2361_v29 = vld [vmem:[%s2993_s1 + $0x48] sm:$0xff]   ;;  %s3339_s30 = sld [smem:[#allocation29_spill]] }
  0xac   : > { %v2360_v28 = vld [vmem:[%s2993_s1 + $0x40] sm:$0xff]   ;;  %v2362_v30 = vld [vmem:[%s2993_s1 + $0x50] sm:$0xff]   ;;  %v2363_v31 = vld [vmem:[%s2993_s1 + $0x58] sm:$0xff]   ;;  %s3341_s24 = sld [smem:[#allocation31_spill]]  ;;  %p2076_p6 = scmp.ne.s32.totalorder %s2568_s18, 1 }
  0xad   : > { %2153 = vmatpush3.bf16.msra.mxu0 %v2360_v28  ;;  %v2040_v54 = vld [vmem:[%s3002_s0 + $0x2] ss:$0 sm:$0xff]  ;;  %s2594_s0 = smov 32   ;;  %vm1755_vm6 = vcmask (!%p2076_p6), 57344   ;;  %vm2596_vm7 = vmmov (!%p2076_p6), 0   ;;  %vm1764_vm8 = vcmask (!%p2076_p6), 516096  }
  0xae   : > { %2131 = vmatpush3.bf16.msra.mxu1 %v2353_v4  ;;  %2154 = vmatprep.subr.bf16.mxu0 %v2591_v3  ;;  %vm1776_vm9 = vcmask (!%p2076_p6), 0  }
  0xaf   : > { %2132 = vmatprep.subr.bf16.mxu1 %v2591_v3  ;;  %s3335_s10 = scalar_lea.vmem %s3334_s4, %s3368_s16 }
  0xb0   : > { %v2046_v45 = vld [vmem:[%s3335_s10] ss:$0 sm:$0xff]  ;;  %s3338_s29 = scalar_lea.vmem %s3337_s13, %s2970_s22 }
  0xb1   : > { %2155 = vmatpush3.bf16.msra.mxu0 %v2361_v29  ;;  %s3340_s3 = scalar_lea.vmem %s3339_s30, %s2970_s22 }
  0xb2   : > { %2133 = vmatpush3.bf16.msra.mxu1 %v2354_v5  ;;  %2156 = vmatprep.subr.bf16.mxu0 %v2591_v3  ;;  %s3342_s7 = scalar_lea.vmem %s3341_s24, %s2970_s22 }
  0xb3   : > { %2134 = vmatprep.subr.bf16.mxu1 %v2591_v3 }
  0xb5   : > { %2157 = vmatpush3.bf16.msra.mxu0 %v2362_v30 }
  0xb6   : > { %2135 = vmatpush3.bf16.msra.mxu1 %v2355_v6  ;;  %2158 = vmatprep.subr.bf16.mxu0 %v2591_v3 }
  0xb7   : > { %2140 = vmatprep.subr.bf16.mxu1 %v2591_v3 }
  0xb9   : > { %2137 = vmatmul.mubr.msk.bf16.vlgmr.msra.gmra.mrb[0].mxu1 %vm903_vm2, %v845_v9  ;;  %2159 = vmatpush3.bf16.msra.mxu0 %v2363_v31 }
  0xba   : > { %2141 = vmatpush3.bf16.msra.mxu1 %v2356_v8  ;;  %2148 = vmatprep.mubr.msk.bf16.mxu1 %vm2592_vm1, %v2591_v3 }
  0xbb   : > { %2142 = vmatprep.subr.bf16.mxu1 %v2591_v3  ;;  %2176 = vmatprep.subr.bf16.mxu0 %v2591_v3 }
  0xbc   : > { %2161 = vmatmul.mubr.msk.bf16.vlgmr.msra.gmra.mrb[0].mxu0 %vm903_vm2, %v845_v9 }
  0xbd   : > { %2178 = vmatprep.mubr.msk.bf16.mxu0 %vm2592_vm1, %v2591_v3 }
  0xbe   : > { %2143 = vmatpush3.bf16.msra.mxu1 %v2357_v10 }
  0xbf   : > { %2144 = vmatprep.subr.bf16.mxu1 %v2591_v3 }
  0xc2   : > { %2145 = vmatpush3.bf16.msra.mxu1 %v2358_v11 }
  0xc3   : > { %2146 = vmatprep.subr.bf16.mxu1 %v2591_v3 }
  0xc6   : > { %2147 = vmatpush3.bf16.msra.mxu1 %v2359_v12 }
  0xc7   : > { %2164 = vmatprep.subr.bf16.mxu1 %v2591_v3 }
  0xc9   : > { %2149 = vmatmul.mubr.msk.bf16.vlgmr.msra.gmra.mrb[4].mxu1 %vm903_vm2, %v845_v9 }
  0xca   : > { %2166 = vmatprep.mubr.msk.bf16.mxu1 %vm2592_vm1, %v2591_v3 }
 0x18c   : > { %v941_v13 = vpop.f32.mrb[0].mxu1 }
 0x18d   : > { %v2138_v14 = vpop.f32.mrb[1].mxu1  ;;  %v942_v25 = vadd.f32 %v2028_v21, %v941_v13 }
 0x18e   : > { %v944_v15 = vpop.f32.mrb[2].mxu1 }
 0x18f   : > { %v2139_v16 = vpop.f32.mrb[3].mxu1  ;;  %v1091_v27 = vpack.c.bf16 %v942_v25, %v942_v25  ;;  %v1081_v41 = vpop.f32.mrb[0].mxu0 }
 0x190   : > { %v2162_v42 = vpop.f32.mrb[1].mxu0  ;;  %v1082_v55 = vadd.f32 %v2040_v54, %v1081_v41 }
 0x191   : > { %v1084_v43 = vpop.f32.mrb[2].mxu0 }
 0x192   : > { %v2163_v44 = vpop.f32.mrb[3].mxu0  ;;  %v1103_v56 = vpack.c.bf16 %v1082_v55, %v1082_v55 }
 0x194   : > { %v1235_v57 = vsel %vm1233_vm5, %v1103_v56, 0 }
 0x195   : > { %2177 = vmatpush3.bf16.msra.mxu0 %v1235_v57 }
 0x196   : > { %2188 = vmatprep.subr.bf16.mxu0 %v2591_v3 }
 0x19c   : > { %v1011_v18 = vpop.f32.mrb[4].mxu1 }
 0x19d   : > { %v1012_v19 = vadd.f32 %v2034_v17, %v1011_v18  ;;  %v2150_v20 = vpop.f32.mrb[5].mxu1  ;;  %v2364_v17 = vld [vmem:[%s2958_s14] sm:$0xff]   ;;  %v2365_v18 = vld [vmem:[%s2958_s14 + $0x8] sm:$0xff]  }
 0x19e   : > { %v1014_v22 = vpop.f32.mrb[6].mxu1  ;;  %v2367_v20 = vld [vmem:[%s2958_s14 + $0x18] sm:$0xff]  }
 0x19f   : > { %v1097_v23 = vpack.c.bf16 %v1012_v19, %v1012_v19  ;;  %1094 = vrot.lane.b32.xlu0 %v1012_v19, %s2593_s28  ;;  %v2151_v24 = vpop.f32.mrb[7].mxu1  ;;  %v2366_v19 = vld [vmem:[%s2958_s14 + $0x10] sm:$0xff]  }
 0x1a1   : > { %v1117_v26 = vsel %vm1112_vm3, %v1097_v23, 0 }
 0x1a2   : > { %2165 = vmatpush3.bf16.xpose.msra.mxu1 %v1117_v26 }
 0x1a3   : > { %1088 = vrot.lane.b32.xlu0 %v942_v25, %s2593_s28  ;;  %2170 = vmatprep.subr.bf16.mxu1 %v2591_v3 }
 0x1a9   : > { %2167 = vmatmul.mubr.msk.bf16.vlgmr.msra.gmra.mrb[8].mxu1 %vm1112_vm3, %v1091_v27 }
 0x1aa   : > { %2172 = vmatprep.mubr.msk.bf16.mxu1 %vm2592_vm1, %v2591_v3 }
 0x211   : > { %v1095_v32 = vpop.permute.xlu0 %1094 }
 0x212   : > { %v1098_v33 = vpack.c.bf16 %v1095_v32, %v1095_v32  ;;  %v2051_v32 = vld [vmem:[%s3336_s9] ss:$0 sm:$0xff]  ;;  %s3346_s9 = sld [smem:[#allocation24_spill]] (!%p2076_p6) }
 0x214   : > { %v1163_v34 = vsel %vm1112_vm3, %v1098_v33, 0 }
 0x215   : > { %2171 = vmatpush3.bf16.xpose.msra.mxu1 %v1163_v34  ;;  %v1089_v35 = vpop.permute.xlu0 %1088 }
 0x216   : > { %2182 = vmatprep.subr.bf16.mxu1 %v2591_v3  ;;  %v1092_v36 = vpack.c.bf16 %v1089_v35, %v1089_v35 }
 0x218   : > { %s3347_s23 = scalar_lea.vmem (!%p2076_p6), %s3346_s9, %s3368_s16 }
 0x21c   : > { %2173 = vmatmul.mubr.msk.bf16.vlgmr.msra.gmra.mrb[12].mxu1 %vm1112_vm3, %v1092_v36 }
 0x21d   : > { %2184 = vmatprep.mubr.msk.bf16.mxu1 %vm2592_vm1, %v2591_v3 }
 0x27c   : > { %v1153_v37 = vpop.f32.mrb[8].mxu1 }
 0x27d   : > { %v2168_v38 = vpop.f32.mrb[9].mxu1  ;;  %v1154_v50 = vadd.f32 %v2046_v45, %v1153_v37 }
 0x27e   : > { %v1156_v39 = vpop.f32.mrb[10].mxu1 }
 0x27f   : > { %v2169_v40 = vpop.f32.mrb[11].mxu1  ;;  %v1206_v53 = vsel %vm1205_vm4, %v1154_v50, -inf }
 0x2ef   : > { %v1199_v46 = vpop.f32.mrb[12].mxu1 }
 0x2f0   : > { %v1200_v47 = vadd.f32 %v2046_v45, %v1199_v46  ;;  %v2174_v48 = vpop.f32.mrb[13].mxu1  ;;  %v2368_v45 = vld [vmem:[%s3030_s2] sm:$0xff]   ;;  %v2369_v46 = vld [vmem:[%s3030_s2 + $0x8] sm:$0xff]  }
 0x2f1   : > { %v1202_v49 = vpop.f32.mrb[14].mxu1  ;;  %v2372_v48 = vld [vmem:[%s3016_s20] sm:$0xff]  }
 0x2f2   : > { %v2175_v51 = vpop.f32.mrb[15].mxu1  ;;  %v1209_v52 = vsel %vm1205_vm4, %v1200_v47, -inf }
 0x2f3   : > { %1210 = vmax.xlane.f32.xlu1 %v1209_v52 }
 0x2f7   : > { %1207 = vmax.xlane.f32.xlu1 %v1206_v53  ;;  %v2057_v53 = vld [vmem:[%s3338_s29] ss:$0 sm:$0xff] }
 0x308   : > { %1100 = vrot.lane.b32.xlu1 %v1082_v55, %s2593_s28  ;;  %v2058_v55 = vld [vmem:[%s3340_s3] ss:$0 sm:$0xff] }
 0x380   : > { %v1211_v58 = vpop.xlane.xlu1 %1210 }
 0x381   : > { %v1213_v59 = vsub.f32 %v1200_v47, %v1211_v58  ;;  %v2371_v47 = vld [vmem:[%s3030_s2 + $0x18] sm:$0xff]  }
 0x383   : > { %v1216_v60 = vmul.f32 1.442695, %v1213_v59  ;;  %v2373_v59 = vld [vmem:[%s3016_s20 + $0x8] sm:$0xff]  }
 0x384   : > { %v1208_v61 = vpop.xlane.xlu1 %1207 }
 0x385   : > { %2380 = vpow2.f32 %v1216_v60  ;;  %v1212_v62 = vsub.f32 %v1154_v50, %v1208_v61  ;;  %v2374_v60 = vld [vmem:[%s3016_s20 + $0x10] sm:$0xff]   ;;  %v2375_v61 = vld [vmem:[%s3016_s20 + $0x18] sm:$0xff]  }
 0x387   : > { %v1214_v63 = vmul.f32 1.442695, %v1212_v62  ;;  %v2376_v62 = vld [vmem:[%s3016_s20 + $0x20] sm:$0xff]  }
 0x388   : > { %v1101_v5 = vpop.permute.xlu1 %1100 }
 0x389   : > { %2382 = vpow2.f32 %v1214_v63  ;;  %v1104_v6 = vpack.c.bf16 %v1101_v5, %v1101_v5  ;;  %v2377_v63 = vld [vmem:[%s3016_s20 + $0x28] sm:$0xff]  }
 0x38b   : > { %v1281_v8 = vsel %vm1233_vm5, %v1104_v6, 0 }
 0x38c   : > { %2183 = vmatpush3.bf16.msra.mxu1 %v1281_v8 }
 0x38d   : > { %2200 = vmatprep.subr.bf16.mxu1 %v2591_v3 }
 0x38f   : > { %v2381_v0 = vpop.eup %2380 }
 0x390   : > { %v1221_v1 = vsel %vm1205_vm4, %v2381_v0, 0.0 }
 0x391   : > { %1222 = vadd.xlane.f32.xlu0 %v1221_v1  ;;  %v2379_v1 = vld [vmem:[%s3016_s20 + $0x38] sm:$0xff]  }
 0x393   : > { %v2383_v2 = vpop.eup %2382 }
 0x394   : > { %v1218_v4 = vsel %vm1205_vm4, %v2383_v2, 0.0 }
 0x395   : > { %1219 = vadd.xlane.f32.xlu1 %v1218_v4 }
 0x41e   : > { %v1223_v9 = vpop.xlane.xlu0 %1222 }
 0x41f   : > { %2384 = vrcp.f32 %v1223_v9 }
 0x422   : > { %v1220_v10 = vpop.xlane.xlu1 %1219 }
 0x423   : > { %2386 = vrcp.f32 %v1220_v10 }
 0x429   : > { %v2385_v11 = vpop.eup %2384 }
 0x42a   : > { %v1227_v12 = vmul.f32 %v2385_v11, %v2381_v0  ;;  %v2378_v0 = vld [vmem:[%s3016_s20 + $0x30] sm:$0xff]  }
 0x42c   : > { %v1229_v13 = vpack.c.bf16 %v1227_v12, %v1227_v12 }
 0x42d   : > { %v2387_v14 = vpop.eup %2386 }
 0x42e   : > { %v1226_v15 = vmul.f32 %v2387_v14, %v2383_v2  ;;  %2185 = vmatmul.mubr.msk.bf16.vlgmr.msra.gmra.mrb[16].mxu1 %vm1205_vm4, %v1229_v13  ;;  %v2059_v2 = vld [vmem:[%s3342_s7] ss:$0 sm:$0xff] }
 0x42f   : > { %2208 = vmatprep.mubr.msk.bf16.mxu1 %vm2592_vm1, %v2591_v3  ;;  %2201 = vmatpush3.bf16.msra.mxu1 %v2368_v45 }
 0x430   : > { %v1228_v16 = vpack.c.bf16 %v1226_v15, %v1226_v15  ;;  %2202 = vmatprep.subr.bf16.mxu1 %v2591_v3 }
 0x432   : > { %2179 = vmatmul.mubr.msk.bf16.vlgmr.msra.gmra.mrb[4].mxu0 %vm1205_vm4, %v1228_v16 }
 0x433   : > { %2196 = vmatprep.mubr.msk.bf16.mxu0 %vm2592_vm1, %v2591_v3  ;;  %2189 = vmatpush3.bf16.msra.mxu0 %v2364_v17 }
 0x434   : > { %2190 = vmatprep.subr.bf16.mxu0 %v2591_v3  ;;  %2203 = vmatpush3.bf16.msra.mxu1 %v2369_v46 }
 0x435   : > { %2204 = vmatprep.subr.bf16.mxu1 %v2591_v3 }
 0x437   : > { %2191 = vmatpush3.bf16.msra.mxu0 %v2365_v18 }
 0x438   : > { %2192 = vmatprep.subr.bf16.mxu0 %v2591_v3 }
 0x43b   : > { %2193 = vmatpush3.bf16.msra.mxu0 %v2366_v19  ;;  %v2065_v19 = vld [vmem:[%s826_s8] ss:$0 sm:$0xff] }
 0x43c   : > { %2194 = vmatprep.subr.bf16.mxu0 %v2591_v3 }
 0x43f   : > { %2195 = vmatpush3.bf16.msra.mxu0 %v2367_v20 }
 0x440   : > { %2212 = vmatprep.subr.bf16.mxu0 %v2591_v3 }
 0x501   : > { %v1317_v21 = vpop.f32.mrb[16].mxu1 }
 0x502   : > { %1324 = vrot.lane.b32.xlu0 %v1317_v21, %s2594_s0  ;;  %v2186_v22 = vpop.f32.mrb[17].mxu1 }
 0x503   : > { %v1320_v23 = vpop.f32.mrb[18].mxu1 }
 0x504   : > { %v2187_v24 = vpop.f32.mrb[19].mxu1 }
 0x505   : > { %v1271_v25 = vpop.f32.mrb[4].mxu0 }
 0x506   : > { %v2180_v26 = vpop.f32.mrb[5].mxu0 }
 0x507   : > { %v1274_v27 = vpop.f32.mrb[6].mxu0 }
 0x508   : > { %v2181_v28 = vpop.f32.mrb[7].mxu0 }
 0x574   : > { %v1325_v29 = vpop.permute.xlu0 %1324 }
 0x575   : > { %v1327_v30 = vsel %vm1112_vm3, %v1271_v25, %v1325_v29 }
 0x576   : > { %v1328_v31 = vpack.c.bf16 %v1327_v30, %v1327_v30 }
 0x578   : > { %2197 = vmatmul.mubr.msk.bf16.vlgmr.msra.gmra.mrb[8].mxu0 %vm903_vm2, %v1328_v31 }
 0x579   : > { %2228 = vmatprep.mubr.msk.bf16.mxu0 %vm2592_vm1, %v2591_v3  ;;  %2213 = vmatpush3.bf16.msra.mxu0 %v2372_v48 }
 0x57a   : > { %2214 = vmatprep.subr.bf16.mxu0 %v2591_v3 }
 0x57d   : > { %2215 = vmatpush3.bf16.msra.mxu0 %v2373_v59 }
 0x57e   : > { %2216 = vmatprep.subr.bf16.mxu0 %v2591_v3 }
 0x581   : > { %2217 = vmatpush3.bf16.msra.mxu0 %v2374_v60 }
 0x582   : > { %2218 = vmatprep.subr.bf16.mxu0 %v2591_v3 }
 0x585   : > { %2219 = vmatpush3.bf16.msra.mxu0 %v2375_v61 }
 0x586   : > { %2220 = vmatprep.subr.bf16.mxu0 %v2591_v3 }
 0x589   : > { %2221 = vmatpush3.bf16.msra.mxu0 %v2376_v62 }
 0x58a   : > { %2222 = vmatprep.subr.bf16.mxu0 %v2591_v3 }
 0x58d   : > { %2223 = vmatpush3.bf16.msra.mxu0 %v2377_v63 }
 0x58e   : > { %2224 = vmatprep.subr.bf16.mxu0 %v2591_v3 }
 0x591   : > { %2225 = vmatpush3.bf16.msra.mxu0 %v2378_v0 }
 0x592   : > { %2226 = vmatprep.subr.bf16.mxu0 %v2591_v3 }
 0x595   : > { %2227 = vmatpush3.bf16.msra.mxu0 %v2379_v1 }
 0x64b   : > { %v1405_v33 = vpop.f32.mrb[8].mxu0 }
 0x64c   : > { %v1406_v34 = vadd.f32 %v2051_v32, %v1405_v33  ;;  %v2198_v35 = vpop.f32.mrb[9].mxu0 }
 0x64d   : > { %v1408_v36 = vpop.f32.mrb[10].mxu0 }
 0x64e   : > { %v2199_v37 = vpop.f32.mrb[11].mxu0  ;;  %v1411_v38 = vadd.f32 %v1406_v34, %v3047_v7  ;;  %v2370_v7 = vld [vmem:[%s3030_s2 + $0x10] sm:$0xff]   ;;  %v2074_v36 = vld [vmem:[%s829_s21] ss:$0 sm:$0xff] }
 0x64f   : > { %2205 = vmatpush3.bf16.msra.mxu1 %v2370_v7 }
 0x650   : > { %v1414_v39 = vsel %vm903_vm2, %v1411_v38, 0.0  ;;  %2206 = vmatprep.subr.bf16.mxu1 %v2591_v3 }
 0x651   : > { %1415 = vadd.xlane.f32.xlu0 %v1414_v39 }
 0x653   : > { %2207 = vmatpush3.bf16.msra.mxu1 %v2371_v47 }
 0x6de   : > { %v1416_v40 = vpop.xlane.xlu0 %1415 }
 0x6df   : > { %v1418_v41 = vmul.f32 0.015625, %v1416_v40 }
 0x6e1   : > { %v1419_v42 = vsub.f32 %v1411_v38, %v1418_v41  ;;  %v2075_v38 = vld [vmem:[%s832_s5] ss:$0 sm:$0xff]  ;;  %s3348_s5 = sld [smem:[#allocation36_spill]] (!%p2076_p6) }
 0x6e2   : > { %v1681_v41 = vld [vmem:[%s3347_s23] sm:$0x1] (!%p2076_p6) }
 0x6e3   : > { %v1420_v43 = vmul.f32 %v1419_v42, %v1419_v42 }
 0x6e5   : > { %v1421_v44 = vsel %vm903_vm2, %v1420_v43, 0.0  ;;  %v1756_v43 = vsel (!%p2076_p6), %vm1755_vm6, %v1681_v41, 0.0 }
 0x6e6   : > { %1422 = vadd.xlane.f32.xlu1 %v1421_v44  ;;  %1757 = vadd.xlane.f32.xlu0 (!%p2076_p6), %v1756_v43 }
 0x6e7   : > { %v1762_v47 = vld [vmem:[%s3348_s5] sm:$0x1] (!%p2076_p6) }
 0x773   : > { %v1423_v49 = vpop.xlane.xlu1 %1422  ;;  %v1758_v44 = vpop.xlane.xlu0 (!%p2076_p6), %1757 }
 0x774   : > { %v1424_v50 = vmul.f32 0.015625, %v1423_v49  ;;  %v1759_v45 = vmax.f32 (!%p2076_p6), %v1758_v44, 1.0 }
 0x776   : > { %v1425_v51 = vadd.f32 1e-12, %v1424_v50 }
 0x778   : > { %2388 = vrsqrt.f32 %v1425_v51 }
 0x782   : > { %v2389_v52 = vpop.eup %2388 }
 0x783   : > { %v1427_v54 = vmul.f32 %v2389_v52, %v1419_v42  ;;  %v2595_v42 = vmov (!%p2076_p6), 0.0   ;;  %v1768_v52 = vld [vmem:[#allocation3] sm:$0x1] (!%p2076_p6) }
 0x784   : > { %2232 = vmatprep.subr.mxu0 (!%p2076_p6), %v2595_v42 }
 0x785   : > { %v1434_v56 = vmul.f32 %v2057_v53, %v1427_v54 }
 0x787   : > { %v1441_v57 = vadd.f32 %v2058_v55, %v1434_v56 }
 0x789   : > { %v1442_v58 = vpack.c.bf16 %v1441_v57, %v1441_v57 }
 0x78b   : > { %2209 = vmatmul.mubr.msk.bf16.vlgmr.msra.gmra.mrb[20].mxu1 %vm903_vm2, %v1442_v58 }
 0x85e   : > { %v1519_v4 = vpop.f32.mrb[20].mxu1 }
 0x85f   : > { %v1520_v5 = vadd.f32 %v2059_v2, %v1519_v4  ;;  %v2210_v6 = vpop.f32.mrb[21].mxu1 }
 0x860   : > { %v1522_v8 = vpop.f32.mrb[22].mxu1 }
 0x861   : > { %v1526_v9 = vmul.f32 0.044715, %v1520_v5  ;;  %v2211_v10 = vpop.f32.mrb[23].mxu1  ;;  %v1525_v3 = vmul.f32 0.5, %v1520_v5 }
 0x863   : > { %v1527_v11 = vmul.f32 %v1526_v9, %v1520_v5 }
 0x865   : > { %v1528_v12 = vmul.f32 %v1527_v11, %v1520_v5 }
 0x867   : > { %v1529_v13 = vadd.f32 %v1528_v12, %v1520_v5 }
 0x869   : > { %v1530_v14 = vmul.f32 0.7978846, %v1529_v13 }
 0x86b   : > { %2390 = vtanh.f32 %v1530_v14 }
 0x875   : > { %v2391_v15 = vpop.eup %2390 }
 0x876   : > { %v1532_v16 = vadd.f32 1.0, %v2391_v15 }
 0x878   : > { %v1533_v17 = vmul.f32 %v1532_v16, %v1525_v3 }
 0x87a   : > { %v1534_v18 = vpack.c.bf16 %v1533_v17, %v1533_v17 }
 0x87c   : > { %2229 = vmatmul.mubr.bf16.vlgmr.msra.gmra.mrb[12].mxu0 %v1534_v18 }
 0x87d   : > { %2234 = vmatprep.mubr.msk.f32.mxu0 (!%p2076_p6), %vm2596_vm7, %v2595_v42 }
 0x94f   : > { %v1640_v20 = vpop.f32.mrb[12].mxu0 }
 0x950   : > { %v1641_v21 = vadd.f32 %v2065_v19, %v1640_v20  ;;  %v2230_v22 = vpop.f32.mrb[13].mxu0 }
 0x951   : > { %v1643_v23 = vpop.f32.mrb[14].mxu0 }
 0x952   : > { %v2231_v24 = vpop.f32.mrb[15].mxu0  ;;  %v1646_v25 = vadd.f32 %v1641_v21, %v1441_v57 }
 0x954   : > { %v1649_v26 = vsel %vm903_vm2, %v1646_v25, 0.0 }
 0x955   : > { %1650 = vadd.xlane.f32.xlu1 %v1649_v26 }
 0x9e2   : > { %v1651_v27 = vpop.xlane.xlu1 %1650 }
 0x9e3   : > { %v1652_v28 = vmul.f32 0.015625, %v1651_v27 }
 0x9e5   : > { %v1653_v29 = vsub.f32 %v1646_v25, %v1652_v28 }
 0x9e7   : > { %v1654_v30 = vmul.f32 %v1653_v29, %v1653_v29 }
 0x9e9   : > { %v1655_v31 = vsel %vm903_vm2, %v1654_v30, 0.0 }
 0x9ea   : > { %1656 = vadd.xlane.f32.xlu1 %v1655_v31 }
 0xa77   : > { %v1657_v32 = vpop.xlane.xlu1 %1656 }
 0xa78   : > { %v1658_v33 = vmul.f32 0.015625, %v1657_v32 }
 0xa7a   : > { %v1659_v34 = vadd.f32 1e-12, %v1658_v33 }
 0xa7c   : > { %2392 = vrsqrt.f32 %v1659_v34 }
 0xa7d   : > { %2394 = vrcp.f32 (!%p2076_p6), %v1759_v45 }
 0xa86   : > { %v2393_v35 = vpop.eup %2392 }
 0xa87   : > { %v1661_v37 = vmul.f32 %v2393_v35, %v1653_v29  ;;  %1680 = sbr.rel (%p2076_p6) target bundleno = 3090 (0xc12), region = 108  ;;  %v2395_v46 = vpop.eup (!%p2076_p6), %2394 }
 0xa89   : > { %v1668_v39 = vmul.f32 %v2074_v36, %v1661_v37 }
 0xa8b   : > { %v1675_v40 = vadd.f32 %v2075_v38, %v1668_v39 }
 0xa8d   : > { %1676 = vst.msk [vmem:[#allocation2] sm:$0xff] %vm903_vm2, %v1675_v40  ;;  %2233 = vmatpush3.msra.mxu0 (!%p2076_p6), %v1675_v40 }
 0xa8e   : > { %2235 = vmatmul.mubr.msk.f32.vlgmr.msra.gmra.mrb[0].mxu0 %vm1205_vm4, %v1681_v41 }
 0xb61   : > { %v1751_v7 = vpop.f32.mrb[0].mxu0 }
 0xb62   : > { %v1761_v48 = vmul.f32 %v2395_v46, %v1751_v7  ;;  %v2236_v49 = vpop.f32.mrb[1].mxu0 }
 0xb64   : > { %v1763_v50 = vmul.f32 %v1762_v47, %v1761_v48 }
 0xb66   : > { %v1765_v51 = vsel %vm1764_vm8, %v1763_v50, 0.0 }
 0xb67   : > { %1766 = vadd.xlane.f32.xlu0 %v1765_v51 }
 0xbf4   : > { %v1767_v53 = vpop.xlane.xlu0 %1766 }
 0xbf5   : > { %v1769_v54 = vadd.f32 %v1768_v52, %v1767_v53 }
 0xbf7   : > { %v2078_v55 = vmul.f32 -1.442695, %v1769_v54 }
 0xbf9   : > { %2396 = vpow2.f32 %v2078_v55 }
 0xc03   : > { %v2397_v56 = vpop.eup %2396 }
 0xc04   : > { %v1773_v57 = vadd.f32 1.0, %v2397_v56 }
 0xc06   : > { %2398 = vrcp.f32 %v1773_v57 }
 0xc10   : > { %v2399_v58 = vpop.eup %2398 }
 0xc11   : > { %1777 = vst.msk [vmem:[%s835_s27] sm:$0x1] %vm1776_vm9, %v2399_v58 }
 0xc12 PF: > { %s3350_s29 = sld [smem:[#allocation17_spill]]  ;;  %s3351_s26 = sld [smem:[#allocation11_spill]] }
 0xc13   : > { %s3352_s27 = sld [smem:[#allocation12_spill]]  ;;  %s3353_s28 = sld [smem:[#allocation19_spill]] }
 0xc14   : > { %s3355_s0 = sld [smem:[#allocation14_spill]]  ;;  %s3356_s30 = sld [smem:[#allocation21_spill]] }
 0xc15   : > { %s3357_s18 = sld [smem:[#allocation15_spill]]  ;;  %s3358_s16 = sld [smem:[#allocation16_spill]] }
 0xc16   : > { %s3359_s19 = sld [smem:[#allocation18_spill]]  ;;  %s3360_s1 = sld [smem:[#allocation20_spill]] }
 0xc18   : > { %s35_s20 = sadd.s32 1, %s3350_s29   ;;  %s3354_s29 = sld [smem:[#allocation13_spill]] }
 0xc19   : > { %p32_p10 = scmp.ge.s32.totalorder %s35_s20, 6  }
 0xc1b   :  { %34 = sbr.rel (!%p32_p10) target bundleno = 26 (0x1a), region = 196 }
 0xc22   :  { %1795 = vsyncpa [#allocation5], 1 }
 0xc23   :  { %1797 = vsyncpa [#allocation5 + $0x1], 1 }
 0xc24   :  { %1798 = vsyncpa [#allocation7], 1 }
 0xc25   :  { %1800 = vsyncpa [#allocation7 + $0x1], 1 }

</bundles_post_ra>
